<compile_context>
chip_gen: v7x
topology: tpu7x:2x2x1
jax: 0.10.0
libtpu: 0.0.40
codegen_flags: <defaults>
</compile_context>

<pallas_src>
import numpy as np
import jax
import jax.numpy as jnp
from jax import lax
from jax.experimental import pallas as pl
from jax.experimental.pallas import tpu as pltpu

# ----------------------- RexQuadrotor constants (deterministic, from __init__) -----------------------
MASS = 2.0
INV_MASS = 1.0 / MASS
J_MAT = np.array([[0.01566089, 3.18037e-06, 0.0],
                  [3.18037e-06, 0.01562078, 0.0],
                  [0.0, 0.0, 0.02226868]], dtype=np.float32)
JINV_MAT = np.linalg.inv(J_MAT).astype(np.float32)
GRAVITY = (0.0, 0.0, -9.81)
MOTOR_DIST = 0.28
KF = 0.0244101
BF = -30.48576
KM = 0.00029958
CD = (0.0, 0.0, 0.0)
CROSS_A = (0.25, 0.25, 0.25)          # [cross_A_x, cross_A_y, cross_A_y] (matches the torch code)
ACT_SCALE = 100.0
DT = 0.05
BF_Z = 4.0 * BF
NX, NU = 12, 4

_SS_RAW = np.array([[1.0, 1.0, 0.0], [1.0, -1.0, 0.0],
                    [-1.0, -1.0, 0.0], [-1.0, 1.0, 0.0]], dtype=np.float32)
SS = _SS_RAW / np.linalg.norm(_SS_RAW, axis=-1, keepdims=True)
ARM_X = tuple(float(MOTOR_DIST * SS[i, 0]) for i in range(NU))   # rotor arm x components
ARM_Y = tuple(float(MOTOR_DIST * SS[i, 1]) for i in range(NU))   # rotor arm y components

# Folded scalar constants (trace-time).
KF_S = KF * ACT_SCALE          # thrust coeff applied to unscaled u
KM_S = KM * ACT_SCALE          # yaw-moment coeff applied to unscaled u
GZ = GRAVITY[2]                # gravity z (acceleration; mass folded out of F/m)
GZ2 = 2.0 * GRAVITY[2]

# Guards for the trace-time structural-zero folding (re-derive the folded math if these change).
assert all(c == 0.0 for c in CD), "drag term folded away assuming cd == 0"
assert GRAVITY[0] == 0.0 and GRAVITY[1] == 0.0, "gravity rotation specialized for (0,0,gz)"
assert all(float(SS[i, 2]) == 0.0 for i in range(NU)), "rotor-arm cross specialized for planar arms"

# TPU tiling constants.
SUB = 8       # sublanes per working sub-tile -> each component sub-tile is exactly one (8,128) vreg
LANES = 128


# ------------------------------ component-tuple math (trace-time folded) ------------------------------
def _cross(a, b):
    return (a[1] * b[2] - a[2] * b[1],
            a[2] * b[0] - a[0] * b[2],
            a[0] * b[1] - a[1] * b[0])


def _matvec3(M, v):
    """3x3 constant-matrix times component-tuple vector; exact-zero entries skipped at trace time."""
    out = []
    for i in range(3):
        acc = None
        for j in range(3):
            c = float(M[i, j])
            if c == 0.0:
                continue
            term = c * v[j]
            acc = term if acc is None else acc + term
        out.append(acc if acc is not None else jnp.zeros_like(v[0]))
    return tuple(out)


def _control_terms(u):
    """u-only quantities hoisted out of the 4 RK stages: collective z-thrust / mass and body torque.

    rotor_fz_i = kf*(act_scale*u_i) + bf ; fz_total = sum_i rotor_fz_i (== kf*sum(us) + 4*bf)."""
    rotor_fz = tuple(KF_S * u[i] + BF for i in range(NU))
    fz_over_m = (rotor_fz[0] + rotor_fz[1] + rotor_fz[2] + rotor_fz[3]) * INV_MASS
    tau_x = (ARM_Y[0] * rotor_fz[0] + ARM_Y[1] * rotor_fz[1]
             + ARM_Y[2] * rotor_fz[2] + ARM_Y[3] * rotor_fz[3])
    tau_y = -(ARM_X[0] * rotor_fz[0] + ARM_X[1] * rotor_fz[1]
              + ARM_X[2] * rotor_fz[2] + ARM_X[3] * rotor_fz[3])
    tau_z = KM_S * (u[0] - u[1] + u[2] - u[3])
    return fz_over_m, (tau_x, tau_y, tau_z)


def _dynamics(x, fz_over_m, tau):
    """xdot for one RK stage. x is a 12-tuple of (8,128) tiles; fz_over_m/tau are hoisted u-only terms."""
    m = x[3:6]
    v = x[6:9]
    w = x[9:12]

    # MRP -> quaternion (scalar first), computed once; q(-m) is just the conjugate.
    nm2 = m[0] * m[0] + m[1] * m[1] + m[2] * m[2]
    one_m = 1.0 - nm2
    denom = 1.0 + nm2
    # EUP approximate reciprocal (frees the VALU slot) + one Newton step -> full f32 accuracy.
    r = pl.reciprocal(denom, approx=True)
    inv = r * (2.0 - denom * r)
    q0 = one_m * inv
    two_inv = inv + inv
    q1 = two_inv * m[0]
    q2 = two_inv * m[1]
    q3 = two_inv * m[2]

    # pdot = R(q) v = v + 2 q0 (qv x v) + 2 qv x (qv x v)
    t1 = (q2 * v[2] - q3 * v[1], q3 * v[0] - q1 * v[2], q1 * v[1] - q2 * v[0])          # qv x v
    t2 = (q2 * t1[2] - q3 * t1[1], q3 * t1[0] - q1 * t1[2], q1 * t1[1] - q2 * t1[0])    # qv x (qv x v)
    q02 = q0 + q0
    pdot = tuple(v[i] + q02 * t1[i] + 2.0 * t2[i] for i in range(3))

    # Gravity acceleration R(conj(q)) (0,0,gz); mass already folded out (this is F/m directly).
    gax = GZ2 * (q1 * q3 - q0 * q2)
    gay = GZ2 * (q2 * q3 + q0 * q1)
    gaz = GZ - GZ2 * (q1 * q1 + q2 * q2)

    # vdot = F/m - w x v   (cd == 0 -> drag folded away; thrust/m hoisted into fz_over_m)
    wxv = _cross(w, v)
    vdot = (gax - wxv[0], gay - wxv[1], fz_over_m + gaz - wxv[2])

    # MRP kinematics: mdot = 0.25 * ((1 - |m|^2) I + 2 [m]x + 2 m m^T) w   (reuses one_m)
    mw = m[0] * w[0] + m[1] * w[1] + m[2] * w[2]
    cmw = _cross(m, w)
    a = 0.25 * one_m
    half_mw = 0.5 * mw
    mdot = tuple(a * w[i] + 0.5 * cmw[i] + half_mw * m[i] for i in range(3))

    # wdot = Jinv (tau - w x (J w))    (sparse 3x3 products, zeros folded)
    Jw = _matvec3(J_MAT, w)
    wJw = _cross(w, Jw)
    tq = tuple(tau[i] - wJw[i] for i in range(3))
    wdot = _matvec3(JINV_MAT, tq)

    return pdot + mdot + vdot + wdot


def _rk4(x, fz_over_m, tau):
    dt, dt2, dt6 = DT, 0.5 * DT, DT / 6.0
    k1 = _dynamics(x, fz_over_m, tau)
    k2 = _dynamics(tuple(x[i] + dt2 * k1[i] for i in range(NX)), fz_over_m, tau)
    k3 = _dynamics(tuple(x[i] + dt2 * k2[i] for i in range(NX)), fz_over_m, tau)
    k4 = _dynamics(tuple(x[i] + dt * k3[i] for i in range(NX)), fz_over_m, tau)
    return tuple(x[i] + dt6 * (k1[i] + 2.0 * k2[i] + 2.0 * k3[i] + k4[i]) for i in range(NX))


# ------------------------------------------ Pallas kernel ------------------------------------------
def _rex_rk4_kernel(x_ref, u_ref, o_ref):
    # x_ref: (NX, S, 128), u_ref: (NU, S, 128), o_ref: (NX, S, 128); S is a multiple of SUB.
    # Inner loop walks (8,128) sub-tiles so each of the ~50 live component values is one vreg.
    n_sub = x_ref.shape[1] // SUB

    def body(s, carry):
        row = pl.multiple_of(s * SUB, SUB)
        x = tuple(x_ref[i, pl.ds(row, SUB), :] for i in range(NX))
        u = tuple(u_ref[i, pl.ds(row, SUB), :] for i in range(NU))
        fz_over_m, tau = _control_terms(u)    # u-only work: done once, not once per RK stage
        y = _rk4(x, fz_over_m, tau)
        for i in range(NX):
            o_ref[i, pl.ds(row, SUB), :] = y[i]    # full (8,128) unmasked stores
        return carry

    lax.fori_loop(0, n_sub, body, 0)


def rex_quadrotor_rk4_tiled(x_tiled, u_tiled, *, max_block_rows=64):
    """RK4 step on pre-tiled inputs: x (NX, SB, 128), u (NU, SB, 128) -> (NX, SB, 128).

    Use this entry point when the caller can keep data in batch-tiled layout (no transposes)."""
    nx, SB, lanes = x_tiled.shape
    assert nx == NX and lanes == LANES and SB % SUB == 0
    assert u_tiled.shape == (NU, SB, LANES)

    # Largest power-of-two multiple of SUB that divides SB, capped (64 rows = 8192 batch / step,
    # ~1.8 MiB double-buffered VMEM; keeps per-grid-step overhead < ~5% of compute).
    s_block = SUB
    while s_block * 2 <= max_block_rows and SB % (s_block * 2) == 0:
        s_block *= 2
    grid = (SB // s_block,)

    return pl.pallas_call(
        _rex_rk4_kernel,
        out_shape=jax.ShapeDtypeStruct((NX, SB, LANES), jnp.float32),
        grid=grid,
        in_specs=[pl.BlockSpec((NX, s_block, LANES), lambda i: (0, i, 0)),
                  pl.BlockSpec((NU, s_block, LANES), lambda i: (0, i, 0))],
        out_specs=pl.BlockSpec((NX, s_block, LANES), lambda i: (0, i, 0)),
        compiler_params=pltpu.CompilerParams(dimension_semantics=("parallel",)),
    )(x_tiled, u_tiled)


def rex_quadrotor_rk4(x, u, *, max_block_rows=64):
    """PyTorch-convention API: x (B, 12), u (B, 4) -> (B, 12). Pads batch to a multiple of 1024."""
    B = x.shape[0]
    x32 = jnp.asarray(x, jnp.float32)
    u32 = jnp.asarray(u, jnp.float32)

    chunk = SUB * LANES
    B_pad = -(-B // chunk) * chunk
    if B_pad != B:
        x32 = jnp.pad(x32, ((0, B_pad - B), (0, 0)))
        u32 = jnp.pad(u32, ((0, B_pad - B), (0, 0)))

    SB = B_pad // LANES
    x_t = x32.T.reshape(NX, SB, LANES)
    u_t = u32.T.reshape(NU, SB, LANES)
    out_t = rex_quadrotor_rk4_tiled(x_t, u_t, max_block_rows=max_block_rows)
    return out_t.reshape(NX, B_pad).T[:B]


# ----------------- pure-JAX reference: faithful, un-optimized transcription of the torch code -----------------
def _mrp2quat_ref(m):
    nm2 = jnp.sum(m * m, axis=-1, keepdims=True)
    return jnp.concatenate([(1.0 - nm2) / (1.0 + nm2), 2.0 * m / (1.0 + nm2)], axis=-1)


def _quatrot_ref(q, v):
    q0 = q[..., :1]
    qv = q[..., 1:]
    t = jnp.cross(qv, v)
    return v + 2.0 * (q0 * t + jnp.cross(qv, t))


def _w2pdot_ref(m, w):
    nm2 = jnp.sum(m * m, axis=-1, keepdims=True)
    mw = jnp.sum(m * w, axis=-1, keepdims=True)
    return 0.25 * ((1.0 - nm2) * w + 2.0 * jnp.cross(m, w) + 2.0 * mw * m)


def _dynamics_ref(x, u):
    u = ACT_SCALE * u
    m = x[..., 3:6]
    v = x[..., 6:9]
    w = x[..., 9:12]
    q = _mrp2quat_ref(m)
    # forces
    qn = _mrp2quat_ref(-m)
    Fz = jnp.sum(KF * u, axis=-1)
    Fcol = jnp.stack([jnp.zeros_like(Fz), jnp.zeros_like(Fz), Fz], axis=-1)
    cd = jnp.asarray(CD, jnp.float32)
    cross_a = jnp.asarray(CROSS_A, jnp.float32)
    df = -jnp.sign(m) * 0.5 * 1.27 * (m * m) * cd * cross_a
    g = jnp.asarray(GRAVITY, jnp.float32)
    bf_vec = jnp.asarray([0.0, 0.0, BF_Z], jnp.float32)
    F = Fcol + df + _quatrot_ref(qn, MASS * g) + bf_vec
    # moments
    Mu = KM * u
    tau3 = Mu[..., 0] - Mu[..., 1] + Mu[..., 2] - Mu[..., 3]
    torque = jnp.stack([jnp.zeros_like(tau3), jnp.zeros_like(tau3), tau3], axis=-1)
    zeros = jnp.zeros_like(u)
    thrust = jnp.stack([zeros, zeros, KF * u + BF], axis=-1)
    ss = jnp.asarray(SS, jnp.float32)
    torque = torque + jnp.cross(MOTOR_DIST * ss, thrust).sum(axis=-2)
    # derivatives
    mdot = _w2pdot_ref(m, w)
    pdot = _quatrot_ref(q, v)
    vdot = F / MASS - jnp.cross(w, v)
    Jm = jnp.asarray(J_MAT)
    Jinv = jnp.asarray(JINV_MAT)
    Jw = (Jm * w[..., None, :]).sum(-1)
    wdot = (Jinv * (torque - jnp.cross(w, Jw))[..., None, :]).sum(-1)
    return jnp.concatenate([pdot, mdot, vdot, wdot], axis=-1)


def rex_quadrotor_rk4_ref(x, u):
    x = jnp.asarray(x, jnp.float32)
    u = jnp.asarray(u, jnp.float32)
    dt, dt2 = DT, DT / 2.0
    k1 = _dynamics_ref(x, u)
    k2 = _dynamics_ref(x + dt2 * k1, u)
    k3 = _dynamics_ref(x + dt2 * k2, u)
    k4 = _dynamics_ref(x + dt * k3, u)
    return x + dt / 6.0 * (k1 + 2.0 * k2 + 2.0 * k3 + k4)


if __name__ == "__main__":
    key = jax.random.PRNGKey(0)
    kx, ku, kx2, ku2 = jax.random.split(key, 4)
    U_HOVER = (-MASS * GRAVITY[2] - BF * 4.0) / ACT_SCALE / KF / 4.0

    # Small case: exercises batch padding + single-block grid.
    B = 256
    x = 0.1 * jax.random.normal(kx, (B, NX), dtype=jnp.float32)
    u = U_HOVER + 0.05 * jax.random.normal(ku, (B, NU), dtype=jnp.float32)
    out = jax.block_until_ready(rex_quadrotor_rk4(x, u))
    ref = jax.block_until_ready(rex_quadrotor_rk4_ref(x, u))
    assert out.shape == (B, NX) and out.dtype == jnp.float32
    # Reference is an independent, un-optimized transcription (different FP rounding path).
    np.testing.assert_allclose(np.asarray(out), np.asarray(ref), rtol=1e-4, atol=1e-5)

    # Larger case: exercises multi-step grid + inner sub-tile loop (SB=128 -> 2 grid steps of 64 rows).
    B2 = 16384
    x2 = 0.1 * jax.random.normal(kx2, (B2, NX), dtype=jnp.float32)
    u2 = U_HOVER + 0.05 * jax.random.normal(ku2, (B2, NU), dtype=jnp.float32)
    out2 = jax.block_until_ready(rex_quadrotor_rk4(x2, u2))
    ref2 = jax.block_until_ready(rex_quadrotor_rk4_ref(x2, u2))
    np.testing.assert_allclose(np.asarray(out2), np.asarray(ref2), rtol=1e-4, atol=1e-5)

    print("KERNEL_OK")
</pallas_src>

<mosaic_0001>
module attributes {stable_mosaic.version = 11 : i64} {
  func.func @_rex_rk4_kernel(%arg0: i32, %arg1: memref<12x8x128xf32, #tpu.memory_space<vmem>>, %arg2: memref<4x8x128xf32, #tpu.memory_space<vmem>>, %arg3: memref<12x8x128xf32, #tpu.memory_space<vmem>>) attributes {dimension_semantics = [#tpu.dimension_semantics<parallel>], iteration_bounds = array<i64: 1>, scalar_prefetch = 0 : i64, scratch_operands = 0 : i64, tpu.core_type = #tpu.core_type<tc>, window_params = [{transform_indices = @transform_0, window_bounds = array<i64: 12, 8, 128>}, {transform_indices = @transform_1, window_bounds = array<i64: 4, 8, 128>}, {transform_indices = @transform_2, window_bounds = array<i64: 12, 8, 128>}]} {
    %c0_i32 = arith.constant 0 : i32
    %c8_i32 = arith.constant 8 : i32
    %0 = arith.muli %c0_i32, %c8_i32 : i32
    %1 = tpu.assume_multiple %0, 8 : i32
    %c0 = arith.constant 0 : index
    %2 = arith.index_cast %1 : i32 to index
    %c0_0 = arith.constant 0 : index
    %3 = vector.load %arg1[%c0, %2, %c0_0] : memref<12x8x128xf32, #tpu.memory_space<vmem>>, vector<1x8x128xf32>
    %4 = vector.shape_cast %3 : vector<1x8x128xf32> to vector<8x128xf32>
    %c1 = arith.constant 1 : index
    %5 = arith.index_cast %1 : i32 to index
    %c0_1 = arith.constant 0 : index
    %6 = vector.load %arg1[%c1, %5, %c0_1] : memref<12x8x128xf32, #tpu.memory_space<vmem>>, vector<1x8x128xf32>
    %7 = vector.shape_cast %6 : vector<1x8x128xf32> to vector<8x128xf32>
    %c2 = arith.constant 2 : index
    %8 = arith.index_cast %1 : i32 to index
    %c0_2 = arith.constant 0 : index
    %9 = vector.load %arg1[%c2, %8, %c0_2] : memref<12x8x128xf32, #tpu.memory_space<vmem>>, vector<1x8x128xf32>
    %10 = vector.shape_cast %9 : vector<1x8x128xf32> to vector<8x128xf32>
    %c3 = arith.constant 3 : index
    %11 = arith.index_cast %1 : i32 to index
    %c0_3 = arith.constant 0 : index
    %12 = vector.load %arg1[%c3, %11, %c0_3] : memref<12x8x128xf32, #tpu.memory_space<vmem>>, vector<1x8x128xf32>
    %13 = vector.shape_cast %12 : vector<1x8x128xf32> to vector<8x128xf32>
    %c4 = arith.constant 4 : index
    %14 = arith.index_cast %1 : i32 to index
    %c0_4 = arith.constant 0 : index
    %15 = vector.load %arg1[%c4, %14, %c0_4] : memref<12x8x128xf32, #tpu.memory_space<vmem>>, vector<1x8x128xf32>
    %16 = vector.shape_cast %15 : vector<1x8x128xf32> to vector<8x128xf32>
    %c5 = arith.constant 5 : index
    %17 = arith.index_cast %1 : i32 to index
    %c0_5 = arith.constant 0 : index
    %18 = vector.load %arg1[%c5, %17, %c0_5] : memref<12x8x128xf32, #tpu.memory_space<vmem>>, vector<1x8x128xf32>
    %19 = vector.shape_cast %18 : vector<1x8x128xf32> to vector<8x128xf32>
    %c6 = arith.constant 6 : index
    %20 = arith.index_cast %1 : i32 to index
    %c0_6 = arith.constant 0 : index
    %21 = vector.load %arg1[%c6, %20, %c0_6] : memref<12x8x128xf32, #tpu.memory_space<vmem>>, vector<1x8x128xf32>
    %22 = vector.shape_cast %21 : vector<1x8x128xf32> to vector<8x128xf32>
    %c7 = arith.constant 7 : index
    %23 = arith.index_cast %1 : i32 to index
    %c0_7 = arith.constant 0 : index
    %24 = vector.load %arg1[%c7, %23, %c0_7] : memref<12x8x128xf32, #tpu.memory_space<vmem>>, vector<1x8x128xf32>
    %25 = vector.shape_cast %24 : vector<1x8x128xf32> to vector<8x128xf32>
    %c8 = arith.constant 8 : index
    %26 = arith.index_cast %1 : i32 to index
    %c0_8 = arith.constant 0 : index
    %27 = vector.load %arg1[%c8, %26, %c0_8] : memref<12x8x128xf32, #tpu.memory_space<vmem>>, vector<1x8x128xf32>
    %28 = vector.shape_cast %27 : vector<1x8x128xf32> to vector<8x128xf32>
    %c9 = arith.constant 9 : index
    %29 = arith.index_cast %1 : i32 to index
    %c0_9 = arith.constant 0 : index
    %30 = vector.load %arg1[%c9, %29, %c0_9] : memref<12x8x128xf32, #tpu.memory_space<vmem>>, vector<1x8x128xf32>
    %31 = vector.shape_cast %30 : vector<1x8x128xf32> to vector<8x128xf32>
    %c10 = arith.constant 10 : index
    %32 = arith.index_cast %1 : i32 to index
    %c0_10 = arith.constant 0 : index
    %33 = vector.load %arg1[%c10, %32, %c0_10] : memref<12x8x128xf32, #tpu.memory_space<vmem>>, vector<1x8x128xf32>
    %34 = vector.shape_cast %33 : vector<1x8x128xf32> to vector<8x128xf32>
    %c11 = arith.constant 11 : index
    %35 = arith.index_cast %1 : i32 to index
    %c0_11 = arith.constant 0 : index
    %36 = vector.load %arg1[%c11, %35, %c0_11] : memref<12x8x128xf32, #tpu.memory_space<vmem>>, vector<1x8x128xf32>
    %37 = vector.shape_cast %36 : vector<1x8x128xf32> to vector<8x128xf32>
    %c0_12 = arith.constant 0 : index
    %38 = arith.index_cast %1 : i32 to index
    %c0_13 = arith.constant 0 : index
    %39 = vector.load %arg2[%c0_12, %38, %c0_13] : memref<4x8x128xf32, #tpu.memory_space<vmem>>, vector<1x8x128xf32>
    %40 = vector.shape_cast %39 : vector<1x8x128xf32> to vector<8x128xf32>
    %c1_14 = arith.constant 1 : index
    %41 = arith.index_cast %1 : i32 to index
    %c0_15 = arith.constant 0 : index
    %42 = vector.load %arg2[%c1_14, %41, %c0_15] : memref<4x8x128xf32, #tpu.memory_space<vmem>>, vector<1x8x128xf32>
    %43 = vector.shape_cast %42 : vector<1x8x128xf32> to vector<8x128xf32>
    %c2_16 = arith.constant 2 : index
    %44 = arith.index_cast %1 : i32 to index
    %c0_17 = arith.constant 0 : index
    %45 = vector.load %arg2[%c2_16, %44, %c0_17] : memref<4x8x128xf32, #tpu.memory_space<vmem>>, vector<1x8x128xf32>
    %46 = vector.shape_cast %45 : vector<1x8x128xf32> to vector<8x128xf32>
    %c3_18 = arith.constant 3 : index
    %47 = arith.index_cast %1 : i32 to index
    %c0_19 = arith.constant 0 : index
    %48 = vector.load %arg2[%c3_18, %47, %c0_19] : memref<4x8x128xf32, #tpu.memory_space<vmem>>, vector<1x8x128xf32>
    %49 = vector.shape_cast %48 : vector<1x8x128xf32> to vector<8x128xf32>
    %cst = arith.constant 2.441010e+00 : f32
    %50 = vector.broadcast %cst : f32 to vector<8x128xf32>
    %51 = arith.mulf %50, %40 : vector<8x128xf32>
    %cst_20 = arith.constant -30.4857597 : f32
    %52 = vector.broadcast %cst_20 : f32 to vector<8x128xf32>
    %53 = arith.addf %51, %52 : vector<8x128xf32>
    %cst_21 = arith.constant 2.441010e+00 : f32
    %54 = vector.broadcast %cst_21 : f32 to vector<8x128xf32>
    %55 = arith.mulf %54, %43 : vector<8x128xf32>
    %cst_22 = arith.constant -30.4857597 : f32
    %56 = vector.broadcast %cst_22 : f32 to vector<8x128xf32>
    %57 = arith.addf %55, %56 : vector<8x128xf32>
    %cst_23 = arith.constant 2.441010e+00 : f32
    %58 = vector.broadcast %cst_23 : f32 to vector<8x128xf32>
    %59 = arith.mulf %58, %46 : vector<8x128xf32>
    %cst_24 = arith.constant -30.4857597 : f32
    %60 = vector.broadcast %cst_24 : f32 to vector<8x128xf32>
    %61 = arith.addf %59, %60 : vector<8x128xf32>
    %cst_25 = arith.constant 2.441010e+00 : f32
    %62 = vector.broadcast %cst_25 : f32 to vector<8x128xf32>
    %63 = arith.mulf %62, %49 : vector<8x128xf32>
    %cst_26 = arith.constant -30.4857597 : f32
    %64 = vector.broadcast %cst_26 : f32 to vector<8x128xf32>
    %65 = arith.addf %63, %64 : vector<8x128xf32>
    %66 = arith.addf %53, %57 : vector<8x128xf32>
    %67 = arith.addf %66, %61 : vector<8x128xf32>
    %68 = arith.addf %67, %65 : vector<8x128xf32>
    %cst_27 = arith.constant 5.000000e-01 : f32
    %69 = vector.broadcast %cst_27 : f32 to vector<8x128xf32>
    %70 = arith.mulf %68, %69 : vector<8x128xf32>
    %cst_28 = arith.constant 0.197989896 : f32
    %71 = vector.broadcast %cst_28 : f32 to vector<8x128xf32>
    %72 = arith.mulf %71, %53 : vector<8x128xf32>
    %cst_29 = arith.constant -0.197989896 : f32
    %73 = vector.broadcast %cst_29 : f32 to vector<8x128xf32>
    %74 = arith.mulf %73, %57 : vector<8x128xf32>
    %75 = arith.addf %72, %74 : vector<8x128xf32>
    %cst_30 = arith.constant -0.197989896 : f32
    %76 = vector.broadcast %cst_30 : f32 to vector<8x128xf32>
    %77 = arith.mulf %76, %61 : vector<8x128xf32>
    %78 = arith.addf %75, %77 : vector<8x128xf32>
    %cst_31 = arith.constant 0.197989896 : f32
    %79 = vector.broadcast %cst_31 : f32 to vector<8x128xf32>
    %80 = arith.mulf %79, %65 : vector<8x128xf32>
    %81 = arith.addf %78, %80 : vector<8x128xf32>
    %cst_32 = arith.constant 0.197989896 : f32
    %82 = vector.broadcast %cst_32 : f32 to vector<8x128xf32>
    %83 = arith.mulf %82, %53 : vector<8x128xf32>
    %cst_33 = arith.constant 0.197989896 : f32
    %84 = vector.broadcast %cst_33 : f32 to vector<8x128xf32>
    %85 = arith.mulf %84, %57 : vector<8x128xf32>
    %86 = arith.addf %83, %85 : vector<8x128xf32>
    %cst_34 = arith.constant -0.197989896 : f32
    %87 = vector.broadcast %cst_34 : f32 to vector<8x128xf32>
    %88 = arith.mulf %87, %61 : vector<8x128xf32>
    %89 = arith.addf %86, %88 : vector<8x128xf32>
    %cst_35 = arith.constant -0.197989896 : f32
    %90 = vector.broadcast %cst_35 : f32 to vector<8x128xf32>
    %91 = arith.mulf %90, %65 : vector<8x128xf32>
    %92 = arith.addf %89, %91 : vector<8x128xf32>
    %cst_36 = arith.constant 0.000000e+00 : f32
    %93 = vector.broadcast %cst_36 : f32 to vector<8x128xf32>
    %94 = arith.subf %93, %92 : vector<8x128xf32>
    %95 = arith.subf %40, %43 : vector<8x128xf32>
    %96 = arith.addf %95, %46 : vector<8x128xf32>
    %97 = arith.subf %96, %49 : vector<8x128xf32>
    %cst_37 = arith.constant 2.995800e-02 : f32
    %98 = vector.broadcast %cst_37 : f32 to vector<8x128xf32>
    %99 = arith.mulf %98, %97 : vector<8x128xf32>
    %100 = arith.mulf %13, %13 : vector<8x128xf32>
    %101 = arith.mulf %16, %16 : vector<8x128xf32>
    %102 = arith.addf %100, %101 : vector<8x128xf32>
    %103 = arith.mulf %19, %19 : vector<8x128xf32>
    %104 = arith.addf %102, %103 : vector<8x128xf32>
    %cst_38 = arith.constant 1.000000e+00 : f32
    %105 = vector.broadcast %cst_38 : f32 to vector<8x128xf32>
    %106 = arith.subf %105, %104 : vector<8x128xf32>
    %cst_39 = arith.constant 1.000000e+00 : f32
    %107 = vector.broadcast %cst_39 : f32 to vector<8x128xf32>
    %108 = arith.addf %107, %104 : vector<8x128xf32>
    %109 = tpu.reciprocal %108 {approx = true} : vector<8x128xf32> -> vector<8x128xf32>
    %110 = arith.mulf %108, %109 : vector<8x128xf32>
    %cst_40 = arith.constant 2.000000e+00 : f32
    %111 = vector.broadcast %cst_40 : f32 to vector<8x128xf32>
    %112 = arith.subf %111, %110 : vector<8x128xf32>
    %113 = arith.mulf %109, %112 : vector<8x128xf32>
    %114 = arith.mulf %106, %113 : vector<8x128xf32>
    %115 = arith.addf %113, %113 : vector<8x128xf32>
    %116 = arith.mulf %115, %13 : vector<8x128xf32>
    %117 = arith.mulf %115, %16 : vector<8x128xf32>
    %118 = arith.mulf %115, %19 : vector<8x128xf32>
    %119 = arith.mulf %117, %28 : vector<8x128xf32>
    %120 = arith.mulf %118, %25 : vector<8x128xf32>
    %121 = arith.subf %119, %120 : vector<8x128xf32>
    %122 = arith.mulf %118, %22 : vector<8x128xf32>
    %123 = arith.mulf %116, %28 : vector<8x128xf32>
    %124 = arith.subf %122, %123 : vector<8x128xf32>
    %125 = arith.mulf %116, %25 : vector<8x128xf32>
    %126 = arith.mulf %117, %22 : vector<8x128xf32>
    %127 = arith.subf %125, %126 : vector<8x128xf32>
    %128 = arith.mulf %117, %127 : vector<8x128xf32>
    %129 = arith.mulf %118, %124 : vector<8x128xf32>
    %130 = arith.subf %128, %129 : vector<8x128xf32>
    %131 = arith.mulf %118, %121 : vector<8x128xf32>
    %132 = arith.mulf %116, %127 : vector<8x128xf32>
    %133 = arith.subf %131, %132 : vector<8x128xf32>
    %134 = arith.mulf %116, %124 : vector<8x128xf32>
    %135 = arith.mulf %117, %121 : vector<8x128xf32>
    %136 = arith.subf %134, %135 : vector<8x128xf32>
    %137 = arith.addf %114, %114 : vector<8x128xf32>
    %138 = arith.mulf %137, %121 : vector<8x128xf32>
    %139 = arith.addf %22, %138 : vector<8x128xf32>
    %cst_41 = arith.constant 2.000000e+00 : f32
    %140 = vector.broadcast %cst_41 : f32 to vector<8x128xf32>
    %141 = arith.mulf %140, %130 : vector<8x128xf32>
    %142 = arith.addf %139, %141 : vector<8x128xf32>
    %143 = arith.mulf %137, %124 : vector<8x128xf32>
    %144 = arith.addf %25, %143 : vector<8x128xf32>
    %cst_42 = arith.constant 2.000000e+00 : f32
    %145 = vector.broadcast %cst_42 : f32 to vector<8x128xf32>
    %146 = arith.mulf %145, %133 : vector<8x128xf32>
    %147 = arith.addf %144, %146 : vector<8x128xf32>
    %148 = arith.mulf %137, %127 : vector<8x128xf32>
    %149 = arith.addf %28, %148 : vector<8x128xf32>
    %cst_43 = arith.constant 2.000000e+00 : f32
    %150 = vector.broadcast %cst_43 : f32 to vector<8x128xf32>
    %151 = arith.mulf %150, %136 : vector<8x128xf32>
    %152 = arith.addf %149, %151 : vector<8x128xf32>
    %153 = arith.mulf %116, %118 : vector<8x128xf32>
    %154 = arith.mulf %114, %117 : vector<8x128xf32>
    %155 = arith.subf %153, %154 : vector<8x128xf32>
    %cst_44 = arith.constant -1.962000e+01 : f32
    %156 = vector.broadcast %cst_44 : f32 to vector<8x128xf32>
    %157 = arith.mulf %156, %155 : vector<8x128xf32>
    %158 = arith.mulf %117, %118 : vector<8x128xf32>
    %159 = arith.mulf %114, %116 : vector<8x128xf32>
    %160 = arith.addf %158, %159 : vector<8x128xf32>
    %cst_45 = arith.constant -1.962000e+01 : f32
    %161 = vector.broadcast %cst_45 : f32 to vector<8x128xf32>
    %162 = arith.mulf %161, %160 : vector<8x128xf32>
    %163 = arith.mulf %116, %116 : vector<8x128xf32>
    %164 = arith.mulf %117, %117 : vector<8x128xf32>
    %165 = arith.addf %163, %164 : vector<8x128xf32>
    %cst_46 = arith.constant -1.962000e+01 : f32
    %166 = vector.broadcast %cst_46 : f32 to vector<8x128xf32>
    %167 = arith.mulf %166, %165 : vector<8x128xf32>
    %cst_47 = arith.constant -9.810000e+00 : f32
    %168 = vector.broadcast %cst_47 : f32 to vector<8x128xf32>
    %169 = arith.subf %168, %167 : vector<8x128xf32>
    %170 = arith.mulf %34, %28 : vector<8x128xf32>
    %171 = arith.mulf %37, %25 : vector<8x128xf32>
    %172 = arith.subf %170, %171 : vector<8x128xf32>
    %173 = arith.mulf %37, %22 : vector<8x128xf32>
    %174 = arith.mulf %31, %28 : vector<8x128xf32>
    %175 = arith.subf %173, %174 : vector<8x128xf32>
    %176 = arith.mulf %31, %25 : vector<8x128xf32>
    %177 = arith.mulf %34, %22 : vector<8x128xf32>
    %178 = arith.subf %176, %177 : vector<8x128xf32>
    %179 = arith.subf %157, %172 : vector<8x128xf32>
    %180 = arith.subf %162, %175 : vector<8x128xf32>
    %181 = arith.addf %70, %169 : vector<8x128xf32>
    %182 = arith.subf %181, %178 : vector<8x128xf32>
    %183 = arith.mulf %13, %31 : vector<8x128xf32>
    %184 = arith.mulf %16, %34 : vector<8x128xf32>
    %185 = arith.addf %183, %184 : vector<8x128xf32>
    %186 = arith.mulf %19, %37 : vector<8x128xf32>
    %187 = arith.addf %185, %186 : vector<8x128xf32>
    %188 = arith.mulf %16, %37 : vector<8x128xf32>
    %189 = arith.mulf %19, %34 : vector<8x128xf32>
    %190 = arith.subf %188, %189 : vector<8x128xf32>
    %191 = arith.mulf %19, %31 : vector<8x128xf32>
    %192 = arith.mulf %13, %37 : vector<8x128xf32>
    %193 = arith.subf %191, %192 : vector<8x128xf32>
    %194 = arith.mulf %13, %34 : vector<8x128xf32>
    %195 = arith.mulf %16, %31 : vector<8x128xf32>
    %196 = arith.subf %194, %195 : vector<8x128xf32>
    %cst_48 = arith.constant 2.500000e-01 : f32
    %197 = vector.broadcast %cst_48 : f32 to vector<8x128xf32>
    %198 = arith.mulf %197, %106 : vector<8x128xf32>
    %cst_49 = arith.constant 5.000000e-01 : f32
    %199 = vector.broadcast %cst_49 : f32 to vector<8x128xf32>
    %200 = arith.mulf %199, %187 : vector<8x128xf32>
    %201 = arith.mulf %198, %31 : vector<8x128xf32>
    %cst_50 = arith.constant 5.000000e-01 : f32
    %202 = vector.broadcast %cst_50 : f32 to vector<8x128xf32>
    %203 = arith.mulf %202, %190 : vector<8x128xf32>
    %204 = arith.addf %201, %203 : vector<8x128xf32>
    %205 = arith.mulf %200, %13 : vector<8x128xf32>
    %206 = arith.addf %204, %205 : vector<8x128xf32>
    %207 = arith.mulf %198, %34 : vector<8x128xf32>
    %cst_51 = arith.constant 5.000000e-01 : f32
    %208 = vector.broadcast %cst_51 : f32 to vector<8x128xf32>
    %209 = arith.mulf %208, %193 : vector<8x128xf32>
    %210 = arith.addf %207, %209 : vector<8x128xf32>
    %211 = arith.mulf %200, %16 : vector<8x128xf32>
    %212 = arith.addf %210, %211 : vector<8x128xf32>
    %213 = arith.mulf %198, %37 : vector<8x128xf32>
    %cst_52 = arith.constant 5.000000e-01 : f32
    %214 = vector.broadcast %cst_52 : f32 to vector<8x128xf32>
    %215 = arith.mulf %214, %196 : vector<8x128xf32>
    %216 = arith.addf %213, %215 : vector<8x128xf32>
    %217 = arith.mulf %200, %19 : vector<8x128xf32>
    %218 = arith.addf %216, %217 : vector<8x128xf32>
    %cst_53 = arith.constant 0.0156608894 : f32
    %219 = vector.broadcast %cst_53 : f32 to vector<8x128xf32>
    %220 = arith.mulf %219, %31 : vector<8x128xf32>
    %cst_54 = arith.constant 3.180370e-06 : f32
    %221 = vector.broadcast %cst_54 : f32 to vector<8x128xf32>
    %222 = arith.mulf %221, %34 : vector<8x128xf32>
    %223 = arith.addf %220, %222 : vector<8x128xf32>
    %cst_55 = arith.constant 3.180370e-06 : f32
    %224 = vector.broadcast %cst_55 : f32 to vector<8x128xf32>
    %225 = arith.mulf %224, %31 : vector<8x128xf32>
    %cst_56 = arith.constant 0.0156207802 : f32
    %226 = vector.broadcast %cst_56 : f32 to vector<8x128xf32>
    %227 = arith.mulf %226, %34 : vector<8x128xf32>
    %228 = arith.addf %225, %227 : vector<8x128xf32>
    %cst_57 = arith.constant 0.0222686809 : f32
    %229 = vector.broadcast %cst_57 : f32 to vector<8x128xf32>
    %230 = arith.mulf %229, %37 : vector<8x128xf32>
    %231 = arith.mulf %34, %230 : vector<8x128xf32>
    %232 = arith.mulf %37, %228 : vector<8x128xf32>
    %233 = arith.subf %231, %232 : vector<8x128xf32>
    %234 = arith.mulf %37, %223 : vector<8x128xf32>
    %235 = arith.mulf %31, %230 : vector<8x128xf32>
    %236 = arith.subf %234, %235 : vector<8x128xf32>
    %237 = arith.mulf %31, %228 : vector<8x128xf32>
    %238 = arith.mulf %34, %223 : vector<8x128xf32>
    %239 = arith.subf %237, %238 : vector<8x128xf32>
    %240 = arith.subf %81, %233 : vector<8x128xf32>
    %241 = arith.subf %94, %236 : vector<8x128xf32>
    %242 = arith.subf %99, %239 : vector<8x128xf32>
    %cst_58 = arith.constant 63.8533363 : f32
    %243 = vector.broadcast %cst_58 : f32 to vector<8x128xf32>
    %244 = arith.mulf %243, %240 : vector<8x128xf32>
    %cst_59 = arith.constant -0.0130004538 : f32
    %245 = vector.broadcast %cst_59 : f32 to vector<8x128xf32>
    %246 = arith.mulf %245, %241 : vector<8x128xf32>
    %247 = arith.addf %244, %246 : vector<8x128xf32>
    %cst_60 = arith.constant -0.0130004538 : f32
    %248 = vector.broadcast %cst_60 : f32 to vector<8x128xf32>
    %249 = arith.mulf %248, %240 : vector<8x128xf32>
    %cst_61 = arith.constant 64.0172882 : f32
    %250 = vector.broadcast %cst_61 : f32 to vector<8x128xf32>
    %251 = arith.mulf %250, %241 : vector<8x128xf32>
    %252 = arith.addf %249, %251 : vector<8x128xf32>
    %cst_62 = arith.constant 44.9061165 : f32
    %253 = vector.broadcast %cst_62 : f32 to vector<8x128xf32>
    %254 = arith.mulf %253, %242 : vector<8x128xf32>
    %cst_63 = arith.constant 2.500000e-02 : f32
    %255 = vector.broadcast %cst_63 : f32 to vector<8x128xf32>
    %256 = arith.mulf %255, %206 : vector<8x128xf32>
    %257 = arith.addf %13, %256 : vector<8x128xf32>
    %cst_64 = arith.constant 2.500000e-02 : f32
    %258 = vector.broadcast %cst_64 : f32 to vector<8x128xf32>
    %259 = arith.mulf %258, %212 : vector<8x128xf32>
    %260 = arith.addf %16, %259 : vector<8x128xf32>
    %cst_65 = arith.constant 2.500000e-02 : f32
    %261 = vector.broadcast %cst_65 : f32 to vector<8x128xf32>
    %262 = arith.mulf %261, %218 : vector<8x128xf32>
    %263 = arith.addf %19, %262 : vector<8x128xf32>
    %cst_66 = arith.constant 2.500000e-02 : f32
    %264 = vector.broadcast %cst_66 : f32 to vector<8x128xf32>
    %265 = arith.mulf %264, %179 : vector<8x128xf32>
    %266 = arith.addf %22, %265 : vector<8x128xf32>
    %cst_67 = arith.constant 2.500000e-02 : f32
    %267 = vector.broadcast %cst_67 : f32 to vector<8x128xf32>
    %268 = arith.mulf %267, %180 : vector<8x128xf32>
    %269 = arith.addf %25, %268 : vector<8x128xf32>
    %cst_68 = arith.constant 2.500000e-02 : f32
    %270 = vector.broadcast %cst_68 : f32 to vector<8x128xf32>
    %271 = arith.mulf %270, %182 : vector<8x128xf32>
    %272 = arith.addf %28, %271 : vector<8x128xf32>
    %cst_69 = arith.constant 2.500000e-02 : f32
    %273 = vector.broadcast %cst_69 : f32 to vector<8x128xf32>
    %274 = arith.mulf %273, %247 : vector<8x128xf32>
    %275 = arith.addf %31, %274 : vector<8x128xf32>
    %cst_70 = arith.constant 2.500000e-02 : f32
    %276 = vector.broadcast %cst_70 : f32 to vector<8x128xf32>
    %277 = arith.mulf %276, %252 : vector<8x128xf32>
    %278 = arith.addf %34, %277 : vector<8x128xf32>
    %cst_71 = arith.constant 2.500000e-02 : f32
    %279 = vector.broadcast %cst_71 : f32 to vector<8x128xf32>
    %280 = arith.mulf %279, %254 : vector<8x128xf32>
    %281 = arith.addf %37, %280 : vector<8x128xf32>
    %282 = arith.mulf %257, %257 : vector<8x128xf32>
    %283 = arith.mulf %260, %260 : vector<8x128xf32>
    %284 = arith.addf %282, %283 : vector<8x128xf32>
    %285 = arith.mulf %263, %263 : vector<8x128xf32>
    %286 = arith.addf %284, %285 : vector<8x128xf32>
    %cst_72 = arith.constant 1.000000e+00 : f32
    %287 = vector.broadcast %cst_72 : f32 to vector<8x128xf32>
    %288 = arith.subf %287, %286 : vector<8x128xf32>
    %cst_73 = arith.constant 1.000000e+00 : f32
    %289 = vector.broadcast %cst_73 : f32 to vector<8x128xf32>
    %290 = arith.addf %289, %286 : vector<8x128xf32>
    %291 = tpu.reciprocal %290 {approx = true} : vector<8x128xf32> -> vector<8x128xf32>
    %292 = arith.mulf %290, %291 : vector<8x128xf32>
    %cst_74 = arith.constant 2.000000e+00 : f32
    %293 = vector.broadcast %cst_74 : f32 to vector<8x128xf32>
    %294 = arith.subf %293, %292 : vector<8x128xf32>
    %295 = arith.mulf %291, %294 : vector<8x128xf32>
    %296 = arith.mulf %288, %295 : vector<8x128xf32>
    %297 = arith.addf %295, %295 : vector<8x128xf32>
    %298 = arith.mulf %297, %257 : vector<8x128xf32>
    %299 = arith.mulf %297, %260 : vector<8x128xf32>
    %300 = arith.mulf %297, %263 : vector<8x128xf32>
    %301 = arith.mulf %299, %272 : vector<8x128xf32>
    %302 = arith.mulf %300, %269 : vector<8x128xf32>
    %303 = arith.subf %301, %302 : vector<8x128xf32>
    %304 = arith.mulf %300, %266 : vector<8x128xf32>
    %305 = arith.mulf %298, %272 : vector<8x128xf32>
    %306 = arith.subf %304, %305 : vector<8x128xf32>
    %307 = arith.mulf %298, %269 : vector<8x128xf32>
    %308 = arith.mulf %299, %266 : vector<8x128xf32>
    %309 = arith.subf %307, %308 : vector<8x128xf32>
    %310 = arith.mulf %299, %309 : vector<8x128xf32>
    %311 = arith.mulf %300, %306 : vector<8x128xf32>
    %312 = arith.subf %310, %311 : vector<8x128xf32>
    %313 = arith.mulf %300, %303 : vector<8x128xf32>
    %314 = arith.mulf %298, %309 : vector<8x128xf32>
    %315 = arith.subf %313, %314 : vector<8x128xf32>
    %316 = arith.mulf %298, %306 : vector<8x128xf32>
    %317 = arith.mulf %299, %303 : vector<8x128xf32>
    %318 = arith.subf %316, %317 : vector<8x128xf32>
    %319 = arith.addf %296, %296 : vector<8x128xf32>
    %320 = arith.mulf %319, %303 : vector<8x128xf32>
    %321 = arith.addf %266, %320 : vector<8x128xf32>
    %cst_75 = arith.constant 2.000000e+00 : f32
    %322 = vector.broadcast %cst_75 : f32 to vector<8x128xf32>
    %323 = arith.mulf %322, %312 : vector<8x128xf32>
    %324 = arith.addf %321, %323 : vector<8x128xf32>
    %325 = arith.mulf %319, %306 : vector<8x128xf32>
    %326 = arith.addf %269, %325 : vector<8x128xf32>
    %cst_76 = arith.constant 2.000000e+00 : f32
    %327 = vector.broadcast %cst_76 : f32 to vector<8x128xf32>
    %328 = arith.mulf %327, %315 : vector<8x128xf32>
    %329 = arith.addf %326, %328 : vector<8x128xf32>
    %330 = arith.mulf %319, %309 : vector<8x128xf32>
    %331 = arith.addf %272, %330 : vector<8x128xf32>
    %cst_77 = arith.constant 2.000000e+00 : f32
    %332 = vector.broadcast %cst_77 : f32 to vector<8x128xf32>
    %333 = arith.mulf %332, %318 : vector<8x128xf32>
    %334 = arith.addf %331, %333 : vector<8x128xf32>
    %335 = arith.mulf %298, %300 : vector<8x128xf32>
    %336 = arith.mulf %296, %299 : vector<8x128xf32>
    %337 = arith.subf %335, %336 : vector<8x128xf32>
    %cst_78 = arith.constant -1.962000e+01 : f32
    %338 = vector.broadcast %cst_78 : f32 to vector<8x128xf32>
    %339 = arith.mulf %338, %337 : vector<8x128xf32>
    %340 = arith.mulf %299, %300 : vector<8x128xf32>
    %341 = arith.mulf %296, %298 : vector<8x128xf32>
    %342 = arith.addf %340, %341 : vector<8x128xf32>
    %cst_79 = arith.constant -1.962000e+01 : f32
    %343 = vector.broadcast %cst_79 : f32 to vector<8x128xf32>
    %344 = arith.mulf %343, %342 : vector<8x128xf32>
    %345 = arith.mulf %298, %298 : vector<8x128xf32>
    %346 = arith.mulf %299, %299 : vector<8x128xf32>
    %347 = arith.addf %345, %346 : vector<8x128xf32>
    %cst_80 = arith.constant -1.962000e+01 : f32
    %348 = vector.broadcast %cst_80 : f32 to vector<8x128xf32>
    %349 = arith.mulf %348, %347 : vector<8x128xf32>
    %cst_81 = arith.constant -9.810000e+00 : f32
    %350 = vector.broadcast %cst_81 : f32 to vector<8x128xf32>
    %351 = arith.subf %350, %349 : vector<8x128xf32>
    %352 = arith.mulf %278, %272 : vector<8x128xf32>
    %353 = arith.mulf %281, %269 : vector<8x128xf32>
    %354 = arith.subf %352, %353 : vector<8x128xf32>
    %355 = arith.mulf %281, %266 : vector<8x128xf32>
    %356 = arith.mulf %275, %272 : vector<8x128xf32>
    %357 = arith.subf %355, %356 : vector<8x128xf32>
    %358 = arith.mulf %275, %269 : vector<8x128xf32>
    %359 = arith.mulf %278, %266 : vector<8x128xf32>
    %360 = arith.subf %358, %359 : vector<8x128xf32>
    %361 = arith.subf %339, %354 : vector<8x128xf32>
    %362 = arith.subf %344, %357 : vector<8x128xf32>
    %363 = arith.addf %70, %351 : vector<8x128xf32>
    %364 = arith.subf %363, %360 : vector<8x128xf32>
    %365 = arith.mulf %257, %275 : vector<8x128xf32>
    %366 = arith.mulf %260, %278 : vector<8x128xf32>
    %367 = arith.addf %365, %366 : vector<8x128xf32>
    %368 = arith.mulf %263, %281 : vector<8x128xf32>
    %369 = arith.addf %367, %368 : vector<8x128xf32>
    %370 = arith.mulf %260, %281 : vector<8x128xf32>
    %371 = arith.mulf %263, %278 : vector<8x128xf32>
    %372 = arith.subf %370, %371 : vector<8x128xf32>
    %373 = arith.mulf %263, %275 : vector<8x128xf32>
    %374 = arith.mulf %257, %281 : vector<8x128xf32>
    %375 = arith.subf %373, %374 : vector<8x128xf32>
    %376 = arith.mulf %257, %278 : vector<8x128xf32>
    %377 = arith.mulf %260, %275 : vector<8x128xf32>
    %378 = arith.subf %376, %377 : vector<8x128xf32>
    %cst_82 = arith.constant 2.500000e-01 : f32
    %379 = vector.broadcast %cst_82 : f32 to vector<8x128xf32>
    %380 = arith.mulf %379, %288 : vector<8x128xf32>
    %cst_83 = arith.constant 5.000000e-01 : f32
    %381 = vector.broadcast %cst_83 : f32 to vector<8x128xf32>
    %382 = arith.mulf %381, %369 : vector<8x128xf32>
    %383 = arith.mulf %380, %275 : vector<8x128xf32>
    %cst_84 = arith.constant 5.000000e-01 : f32
    %384 = vector.broadcast %cst_84 : f32 to vector<8x128xf32>
    %385 = arith.mulf %384, %372 : vector<8x128xf32>
    %386 = arith.addf %383, %385 : vector<8x128xf32>
    %387 = arith.mulf %382, %257 : vector<8x128xf32>
    %388 = arith.addf %386, %387 : vector<8x128xf32>
    %389 = arith.mulf %380, %278 : vector<8x128xf32>
    %cst_85 = arith.constant 5.000000e-01 : f32
    %390 = vector.broadcast %cst_85 : f32 to vector<8x128xf32>
    %391 = arith.mulf %390, %375 : vector<8x128xf32>
    %392 = arith.addf %389, %391 : vector<8x128xf32>
    %393 = arith.mulf %382, %260 : vector<8x128xf32>
    %394 = arith.addf %392, %393 : vector<8x128xf32>
    %395 = arith.mulf %380, %281 : vector<8x128xf32>
    %cst_86 = arith.constant 5.000000e-01 : f32
    %396 = vector.broadcast %cst_86 : f32 to vector<8x128xf32>
    %397 = arith.mulf %396, %378 : vector<8x128xf32>
    %398 = arith.addf %395, %397 : vector<8x128xf32>
    %399 = arith.mulf %382, %263 : vector<8x128xf32>
    %400 = arith.addf %398, %399 : vector<8x128xf32>
    %cst_87 = arith.constant 0.0156608894 : f32
    %401 = vector.broadcast %cst_87 : f32 to vector<8x128xf32>
    %402 = arith.mulf %401, %275 : vector<8x128xf32>
    %cst_88 = arith.constant 3.180370e-06 : f32
    %403 = vector.broadcast %cst_88 : f32 to vector<8x128xf32>
    %404 = arith.mulf %403, %278 : vector<8x128xf32>
    %405 = arith.addf %402, %404 : vector<8x128xf32>
    %cst_89 = arith.constant 3.180370e-06 : f32
    %406 = vector.broadcast %cst_89 : f32 to vector<8x128xf32>
    %407 = arith.mulf %406, %275 : vector<8x128xf32>
    %cst_90 = arith.constant 0.0156207802 : f32
    %408 = vector.broadcast %cst_90 : f32 to vector<8x128xf32>
    %409 = arith.mulf %408, %278 : vector<8x128xf32>
    %410 = arith.addf %407, %409 : vector<8x128xf32>
    %cst_91 = arith.constant 0.0222686809 : f32
    %411 = vector.broadcast %cst_91 : f32 to vector<8x128xf32>
    %412 = arith.mulf %411, %281 : vector<8x128xf32>
    %413 = arith.mulf %278, %412 : vector<8x128xf32>
    %414 = arith.mulf %281, %410 : vector<8x128xf32>
    %415 = arith.subf %413, %414 : vector<8x128xf32>
    %416 = arith.mulf %281, %405 : vector<8x128xf32>
    %417 = arith.mulf %275, %412 : vector<8x128xf32>
    %418 = arith.subf %416, %417 : vector<8x128xf32>
    %419 = arith.mulf %275, %410 : vector<8x128xf32>
    %420 = arith.mulf %278, %405 : vector<8x128xf32>
    %421 = arith.subf %419, %420 : vector<8x128xf32>
    %422 = arith.subf %81, %415 : vector<8x128xf32>
    %423 = arith.subf %94, %418 : vector<8x128xf32>
    %424 = arith.subf %99, %421 : vector<8x128xf32>
    %cst_92 = arith.constant 63.8533363 : f32
    %425 = vector.broadcast %cst_92 : f32 to vector<8x128xf32>
    %426 = arith.mulf %425, %422 : vector<8x128xf32>
    %cst_93 = arith.constant -0.0130004538 : f32
    %427 = vector.broadcast %cst_93 : f32 to vector<8x128xf32>
    %428 = arith.mulf %427, %423 : vector<8x128xf32>
    %429 = arith.addf %426, %428 : vector<8x128xf32>
    %cst_94 = arith.constant -0.0130004538 : f32
    %430 = vector.broadcast %cst_94 : f32 to vector<8x128xf32>
    %431 = arith.mulf %430, %422 : vector<8x128xf32>
    %cst_95 = arith.constant 64.0172882 : f32
    %432 = vector.broadcast %cst_95 : f32 to vector<8x128xf32>
    %433 = arith.mulf %432, %423 : vector<8x128xf32>
    %434 = arith.addf %431, %433 : vector<8x128xf32>
    %cst_96 = arith.constant 44.9061165 : f32
    %435 = vector.broadcast %cst_96 : f32 to vector<8x128xf32>
    %436 = arith.mulf %435, %424 : vector<8x128xf32>
    %cst_97 = arith.constant 2.500000e-02 : f32
    %437 = vector.broadcast %cst_97 : f32 to vector<8x128xf32>
    %438 = arith.mulf %437, %388 : vector<8x128xf32>
    %439 = arith.addf %13, %438 : vector<8x128xf32>
    %cst_98 = arith.constant 2.500000e-02 : f32
    %440 = vector.broadcast %cst_98 : f32 to vector<8x128xf32>
    %441 = arith.mulf %440, %394 : vector<8x128xf32>
    %442 = arith.addf %16, %441 : vector<8x128xf32>
    %cst_99 = arith.constant 2.500000e-02 : f32
    %443 = vector.broadcast %cst_99 : f32 to vector<8x128xf32>
    %444 = arith.mulf %443, %400 : vector<8x128xf32>
    %445 = arith.addf %19, %444 : vector<8x128xf32>
    %cst_100 = arith.constant 2.500000e-02 : f32
    %446 = vector.broadcast %cst_100 : f32 to vector<8x128xf32>
    %447 = arith.mulf %446, %361 : vector<8x128xf32>
    %448 = arith.addf %22, %447 : vector<8x128xf32>
    %cst_101 = arith.constant 2.500000e-02 : f32
    %449 = vector.broadcast %cst_101 : f32 to vector<8x128xf32>
    %450 = arith.mulf %449, %362 : vector<8x128xf32>
    %451 = arith.addf %25, %450 : vector<8x128xf32>
    %cst_102 = arith.constant 2.500000e-02 : f32
    %452 = vector.broadcast %cst_102 : f32 to vector<8x128xf32>
    %453 = arith.mulf %452, %364 : vector<8x128xf32>
    %454 = arith.addf %28, %453 : vector<8x128xf32>
    %cst_103 = arith.constant 2.500000e-02 : f32
    %455 = vector.broadcast %cst_103 : f32 to vector<8x128xf32>
    %456 = arith.mulf %455, %429 : vector<8x128xf32>
    %457 = arith.addf %31, %456 : vector<8x128xf32>
    %cst_104 = arith.constant 2.500000e-02 : f32
    %458 = vector.broadcast %cst_104 : f32 to vector<8x128xf32>
    %459 = arith.mulf %458, %434 : vector<8x128xf32>
    %460 = arith.addf %34, %459 : vector<8x128xf32>
    %cst_105 = arith.constant 2.500000e-02 : f32
    %461 = vector.broadcast %cst_105 : f32 to vector<8x128xf32>
    %462 = arith.mulf %461, %436 : vector<8x128xf32>
    %463 = arith.addf %37, %462 : vector<8x128xf32>
    %464 = arith.mulf %439, %439 : vector<8x128xf32>
    %465 = arith.mulf %442, %442 : vector<8x128xf32>
    %466 = arith.addf %464, %465 : vector<8x128xf32>
    %467 = arith.mulf %445, %445 : vector<8x128xf32>
    %468 = arith.addf %466, %467 : vector<8x128xf32>
    %cst_106 = arith.constant 1.000000e+00 : f32
    %469 = vector.broadcast %cst_106 : f32 to vector<8x128xf32>
    %470 = arith.subf %469, %468 : vector<8x128xf32>
    %cst_107 = arith.constant 1.000000e+00 : f32
    %471 = vector.broadcast %cst_107 : f32 to vector<8x128xf32>
    %472 = arith.addf %471, %468 : vector<8x128xf32>
    %473 = tpu.reciprocal %472 {approx = true} : vector<8x128xf32> -> vector<8x128xf32>
    %474 = arith.mulf %472, %473 : vector<8x128xf32>
    %cst_108 = arith.constant 2.000000e+00 : f32
    %475 = vector.broadcast %cst_108 : f32 to vector<8x128xf32>
    %476 = arith.subf %475, %474 : vector<8x128xf32>
    %477 = arith.mulf %473, %476 : vector<8x128xf32>
    %478 = arith.mulf %470, %477 : vector<8x128xf32>
    %479 = arith.addf %477, %477 : vector<8x128xf32>
    %480 = arith.mulf %479, %439 : vector<8x128xf32>
    %481 = arith.mulf %479, %442 : vector<8x128xf32>
    %482 = arith.mulf %479, %445 : vector<8x128xf32>
    %483 = arith.mulf %481, %454 : vector<8x128xf32>
    %484 = arith.mulf %482, %451 : vector<8x128xf32>
    %485 = arith.subf %483, %484 : vector<8x128xf32>
    %486 = arith.mulf %482, %448 : vector<8x128xf32>
    %487 = arith.mulf %480, %454 : vector<8x128xf32>
    %488 = arith.subf %486, %487 : vector<8x128xf32>
    %489 = arith.mulf %480, %451 : vector<8x128xf32>
    %490 = arith.mulf %481, %448 : vector<8x128xf32>
    %491 = arith.subf %489, %490 : vector<8x128xf32>
    %492 = arith.mulf %481, %491 : vector<8x128xf32>
    %493 = arith.mulf %482, %488 : vector<8x128xf32>
    %494 = arith.subf %492, %493 : vector<8x128xf32>
    %495 = arith.mulf %482, %485 : vector<8x128xf32>
    %496 = arith.mulf %480, %491 : vector<8x128xf32>
    %497 = arith.subf %495, %496 : vector<8x128xf32>
    %498 = arith.mulf %480, %488 : vector<8x128xf32>
    %499 = arith.mulf %481, %485 : vector<8x128xf32>
    %500 = arith.subf %498, %499 : vector<8x128xf32>
    %501 = arith.addf %478, %478 : vector<8x128xf32>
    %502 = arith.mulf %501, %485 : vector<8x128xf32>
    %503 = arith.addf %448, %502 : vector<8x128xf32>
    %cst_109 = arith.constant 2.000000e+00 : f32
    %504 = vector.broadcast %cst_109 : f32 to vector<8x128xf32>
    %505 = arith.mulf %504, %494 : vector<8x128xf32>
    %506 = arith.addf %503, %505 : vector<8x128xf32>
    %507 = arith.mulf %501, %488 : vector<8x128xf32>
    %508 = arith.addf %451, %507 : vector<8x128xf32>
    %cst_110 = arith.constant 2.000000e+00 : f32
    %509 = vector.broadcast %cst_110 : f32 to vector<8x128xf32>
    %510 = arith.mulf %509, %497 : vector<8x128xf32>
    %511 = arith.addf %508, %510 : vector<8x128xf32>
    %512 = arith.mulf %501, %491 : vector<8x128xf32>
    %513 = arith.addf %454, %512 : vector<8x128xf32>
    %cst_111 = arith.constant 2.000000e+00 : f32
    %514 = vector.broadcast %cst_111 : f32 to vector<8x128xf32>
    %515 = arith.mulf %514, %500 : vector<8x128xf32>
    %516 = arith.addf %513, %515 : vector<8x128xf32>
    %517 = arith.mulf %480, %482 : vector<8x128xf32>
    %518 = arith.mulf %478, %481 : vector<8x128xf32>
    %519 = arith.subf %517, %518 : vector<8x128xf32>
    %cst_112 = arith.constant -1.962000e+01 : f32
    %520 = vector.broadcast %cst_112 : f32 to vector<8x128xf32>
    %521 = arith.mulf %520, %519 : vector<8x128xf32>
    %522 = arith.mulf %481, %482 : vector<8x128xf32>
    %523 = arith.mulf %478, %480 : vector<8x128xf32>
    %524 = arith.addf %522, %523 : vector<8x128xf32>
    %cst_113 = arith.constant -1.962000e+01 : f32
    %525 = vector.broadcast %cst_113 : f32 to vector<8x128xf32>
    %526 = arith.mulf %525, %524 : vector<8x128xf32>
    %527 = arith.mulf %480, %480 : vector<8x128xf32>
    %528 = arith.mulf %481, %481 : vector<8x128xf32>
    %529 = arith.addf %527, %528 : vector<8x128xf32>
    %cst_114 = arith.constant -1.962000e+01 : f32
    %530 = vector.broadcast %cst_114 : f32 to vector<8x128xf32>
    %531 = arith.mulf %530, %529 : vector<8x128xf32>
    %cst_115 = arith.constant -9.810000e+00 : f32
    %532 = vector.broadcast %cst_115 : f32 to vector<8x128xf32>
    %533 = arith.subf %532, %531 : vector<8x128xf32>
    %534 = arith.mulf %460, %454 : vector<8x128xf32>
    %535 = arith.mulf %463, %451 : vector<8x128xf32>
    %536 = arith.subf %534, %535 : vector<8x128xf32>
    %537 = arith.mulf %463, %448 : vector<8x128xf32>
    %538 = arith.mulf %457, %454 : vector<8x128xf32>
    %539 = arith.subf %537, %538 : vector<8x128xf32>
    %540 = arith.mulf %457, %451 : vector<8x128xf32>
    %541 = arith.mulf %460, %448 : vector<8x128xf32>
    %542 = arith.subf %540, %541 : vector<8x128xf32>
    %543 = arith.subf %521, %536 : vector<8x128xf32>
    %544 = arith.subf %526, %539 : vector<8x128xf32>
    %545 = arith.addf %70, %533 : vector<8x128xf32>
    %546 = arith.subf %545, %542 : vector<8x128xf32>
    %547 = arith.mulf %439, %457 : vector<8x128xf32>
    %548 = arith.mulf %442, %460 : vector<8x128xf32>
    %549 = arith.addf %547, %548 : vector<8x128xf32>
    %550 = arith.mulf %445, %463 : vector<8x128xf32>
    %551 = arith.addf %549, %550 : vector<8x128xf32>
    %552 = arith.mulf %442, %463 : vector<8x128xf32>
    %553 = arith.mulf %445, %460 : vector<8x128xf32>
    %554 = arith.subf %552, %553 : vector<8x128xf32>
    %555 = arith.mulf %445, %457 : vector<8x128xf32>
    %556 = arith.mulf %439, %463 : vector<8x128xf32>
    %557 = arith.subf %555, %556 : vector<8x128xf32>
    %558 = arith.mulf %439, %460 : vector<8x128xf32>
    %559 = arith.mulf %442, %457 : vector<8x128xf32>
    %560 = arith.subf %558, %559 : vector<8x128xf32>
    %cst_116 = arith.constant 2.500000e-01 : f32
    %561 = vector.broadcast %cst_116 : f32 to vector<8x128xf32>
    %562 = arith.mulf %561, %470 : vector<8x128xf32>
    %cst_117 = arith.constant 5.000000e-01 : f32
    %563 = vector.broadcast %cst_117 : f32 to vector<8x128xf32>
    %564 = arith.mulf %563, %551 : vector<8x128xf32>
    %565 = arith.mulf %562, %457 : vector<8x128xf32>
    %cst_118 = arith.constant 5.000000e-01 : f32
    %566 = vector.broadcast %cst_118 : f32 to vector<8x128xf32>
    %567 = arith.mulf %566, %554 : vector<8x128xf32>
    %568 = arith.addf %565, %567 : vector<8x128xf32>
    %569 = arith.mulf %564, %439 : vector<8x128xf32>
    %570 = arith.addf %568, %569 : vector<8x128xf32>
    %571 = arith.mulf %562, %460 : vector<8x128xf32>
    %cst_119 = arith.constant 5.000000e-01 : f32
    %572 = vector.broadcast %cst_119 : f32 to vector<8x128xf32>
    %573 = arith.mulf %572, %557 : vector<8x128xf32>
    %574 = arith.addf %571, %573 : vector<8x128xf32>
    %575 = arith.mulf %564, %442 : vector<8x128xf32>
    %576 = arith.addf %574, %575 : vector<8x128xf32>
    %577 = arith.mulf %562, %463 : vector<8x128xf32>
    %cst_120 = arith.constant 5.000000e-01 : f32
    %578 = vector.broadcast %cst_120 : f32 to vector<8x128xf32>
    %579 = arith.mulf %578, %560 : vector<8x128xf32>
    %580 = arith.addf %577, %579 : vector<8x128xf32>
    %581 = arith.mulf %564, %445 : vector<8x128xf32>
    %582 = arith.addf %580, %581 : vector<8x128xf32>
    %cst_121 = arith.constant 0.0156608894 : f32
    %583 = vector.broadcast %cst_121 : f32 to vector<8x128xf32>
    %584 = arith.mulf %583, %457 : vector<8x128xf32>
    %cst_122 = arith.constant 3.180370e-06 : f32
    %585 = vector.broadcast %cst_122 : f32 to vector<8x128xf32>
    %586 = arith.mulf %585, %460 : vector<8x128xf32>
    %587 = arith.addf %584, %586 : vector<8x128xf32>
    %cst_123 = arith.constant 3.180370e-06 : f32
    %588 = vector.broadcast %cst_123 : f32 to vector<8x128xf32>
    %589 = arith.mulf %588, %457 : vector<8x128xf32>
    %cst_124 = arith.constant 0.0156207802 : f32
    %590 = vector.broadcast %cst_124 : f32 to vector<8x128xf32>
    %591 = arith.mulf %590, %460 : vector<8x128xf32>
    %592 = arith.addf %589, %591 : vector<8x128xf32>
    %cst_125 = arith.constant 0.0222686809 : f32
    %593 = vector.broadcast %cst_125 : f32 to vector<8x128xf32>
    %594 = arith.mulf %593, %463 : vector<8x128xf32>
    %595 = arith.mulf %460, %594 : vector<8x128xf32>
    %596 = arith.mulf %463, %592 : vector<8x128xf32>
    %597 = arith.subf %595, %596 : vector<8x128xf32>
    %598 = arith.mulf %463, %587 : vector<8x128xf32>
    %599 = arith.mulf %457, %594 : vector<8x128xf32>
    %600 = arith.subf %598, %599 : vector<8x128xf32>
    %601 = arith.mulf %457, %592 : vector<8x128xf32>
    %602 = arith.mulf %460, %587 : vector<8x128xf32>
    %603 = arith.subf %601, %602 : vector<8x128xf32>
    %604 = arith.subf %81, %597 : vector<8x128xf32>
    %605 = arith.subf %94, %600 : vector<8x128xf32>
    %606 = arith.subf %99, %603 : vector<8x128xf32>
    %cst_126 = arith.constant 63.8533363 : f32
    %607 = vector.broadcast %cst_126 : f32 to vector<8x128xf32>
    %608 = arith.mulf %607, %604 : vector<8x128xf32>
    %cst_127 = arith.constant -0.0130004538 : f32
    %609 = vector.broadcast %cst_127 : f32 to vector<8x128xf32>
    %610 = arith.mulf %609, %605 : vector<8x128xf32>
    %611 = arith.addf %608, %610 : vector<8x128xf32>
    %cst_128 = arith.constant -0.0130004538 : f32
    %612 = vector.broadcast %cst_128 : f32 to vector<8x128xf32>
    %613 = arith.mulf %612, %604 : vector<8x128xf32>
    %cst_129 = arith.constant 64.0172882 : f32
    %614 = vector.broadcast %cst_129 : f32 to vector<8x128xf32>
    %615 = arith.mulf %614, %605 : vector<8x128xf32>
    %616 = arith.addf %613, %615 : vector<8x128xf32>
    %cst_130 = arith.constant 44.9061165 : f32
    %617 = vector.broadcast %cst_130 : f32 to vector<8x128xf32>
    %618 = arith.mulf %617, %606 : vector<8x128xf32>
    %cst_131 = arith.constant 5.000000e-02 : f32
    %619 = vector.broadcast %cst_131 : f32 to vector<8x128xf32>
    %620 = arith.mulf %619, %570 : vector<8x128xf32>
    %621 = arith.addf %13, %620 : vector<8x128xf32>
    %cst_132 = arith.constant 5.000000e-02 : f32
    %622 = vector.broadcast %cst_132 : f32 to vector<8x128xf32>
    %623 = arith.mulf %622, %576 : vector<8x128xf32>
    %624 = arith.addf %16, %623 : vector<8x128xf32>
    %cst_133 = arith.constant 5.000000e-02 : f32
    %625 = vector.broadcast %cst_133 : f32 to vector<8x128xf32>
    %626 = arith.mulf %625, %582 : vector<8x128xf32>
    %627 = arith.addf %19, %626 : vector<8x128xf32>
    %cst_134 = arith.constant 5.000000e-02 : f32
    %628 = vector.broadcast %cst_134 : f32 to vector<8x128xf32>
    %629 = arith.mulf %628, %543 : vector<8x128xf32>
    %630 = arith.addf %22, %629 : vector<8x128xf32>
    %cst_135 = arith.constant 5.000000e-02 : f32
    %631 = vector.broadcast %cst_135 : f32 to vector<8x128xf32>
    %632 = arith.mulf %631, %544 : vector<8x128xf32>
    %633 = arith.addf %25, %632 : vector<8x128xf32>
    %cst_136 = arith.constant 5.000000e-02 : f32
    %634 = vector.broadcast %cst_136 : f32 to vector<8x128xf32>
    %635 = arith.mulf %634, %546 : vector<8x128xf32>
    %636 = arith.addf %28, %635 : vector<8x128xf32>
    %cst_137 = arith.constant 5.000000e-02 : f32
    %637 = vector.broadcast %cst_137 : f32 to vector<8x128xf32>
    %638 = arith.mulf %637, %611 : vector<8x128xf32>
    %639 = arith.addf %31, %638 : vector<8x128xf32>
    %cst_138 = arith.constant 5.000000e-02 : f32
    %640 = vector.broadcast %cst_138 : f32 to vector<8x128xf32>
    %641 = arith.mulf %640, %616 : vector<8x128xf32>
    %642 = arith.addf %34, %641 : vector<8x128xf32>
    %cst_139 = arith.constant 5.000000e-02 : f32
    %643 = vector.broadcast %cst_139 : f32 to vector<8x128xf32>
    %644 = arith.mulf %643, %618 : vector<8x128xf32>
    %645 = arith.addf %37, %644 : vector<8x128xf32>
    %646 = arith.mulf %621, %621 : vector<8x128xf32>
    %647 = arith.mulf %624, %624 : vector<8x128xf32>
    %648 = arith.addf %646, %647 : vector<8x128xf32>
    %649 = arith.mulf %627, %627 : vector<8x128xf32>
    %650 = arith.addf %648, %649 : vector<8x128xf32>
    %cst_140 = arith.constant 1.000000e+00 : f32
    %651 = vector.broadcast %cst_140 : f32 to vector<8x128xf32>
    %652 = arith.subf %651, %650 : vector<8x128xf32>
    %cst_141 = arith.constant 1.000000e+00 : f32
    %653 = vector.broadcast %cst_141 : f32 to vector<8x128xf32>
    %654 = arith.addf %653, %650 : vector<8x128xf32>
    %655 = tpu.reciprocal %654 {approx = true} : vector<8x128xf32> -> vector<8x128xf32>
    %656 = arith.mulf %654, %655 : vector<8x128xf32>
    %cst_142 = arith.constant 2.000000e+00 : f32
    %657 = vector.broadcast %cst_142 : f32 to vector<8x128xf32>
    %658 = arith.subf %657, %656 : vector<8x128xf32>
    %659 = arith.mulf %655, %658 : vector<8x128xf32>
    %660 = arith.mulf %652, %659 : vector<8x128xf32>
    %661 = arith.addf %659, %659 : vector<8x128xf32>
    %662 = arith.mulf %661, %621 : vector<8x128xf32>
    %663 = arith.mulf %661, %624 : vector<8x128xf32>
    %664 = arith.mulf %661, %627 : vector<8x128xf32>
    %665 = arith.mulf %663, %636 : vector<8x128xf32>
    %666 = arith.mulf %664, %633 : vector<8x128xf32>
    %667 = arith.subf %665, %666 : vector<8x128xf32>
    %668 = arith.mulf %664, %630 : vector<8x128xf32>
    %669 = arith.mulf %662, %636 : vector<8x128xf32>
    %670 = arith.subf %668, %669 : vector<8x128xf32>
    %671 = arith.mulf %662, %633 : vector<8x128xf32>
    %672 = arith.mulf %663, %630 : vector<8x128xf32>
    %673 = arith.subf %671, %672 : vector<8x128xf32>
    %674 = arith.mulf %663, %673 : vector<8x128xf32>
    %675 = arith.mulf %664, %670 : vector<8x128xf32>
    %676 = arith.subf %674, %675 : vector<8x128xf32>
    %677 = arith.mulf %664, %667 : vector<8x128xf32>
    %678 = arith.mulf %662, %673 : vector<8x128xf32>
    %679 = arith.subf %677, %678 : vector<8x128xf32>
    %680 = arith.mulf %662, %670 : vector<8x128xf32>
    %681 = arith.mulf %663, %667 : vector<8x128xf32>
    %682 = arith.subf %680, %681 : vector<8x128xf32>
    %683 = arith.addf %660, %660 : vector<8x128xf32>
    %684 = arith.mulf %683, %667 : vector<8x128xf32>
    %685 = arith.addf %630, %684 : vector<8x128xf32>
    %cst_143 = arith.constant 2.000000e+00 : f32
    %686 = vector.broadcast %cst_143 : f32 to vector<8x128xf32>
    %687 = arith.mulf %686, %676 : vector<8x128xf32>
    %688 = arith.addf %685, %687 : vector<8x128xf32>
    %689 = arith.mulf %683, %670 : vector<8x128xf32>
    %690 = arith.addf %633, %689 : vector<8x128xf32>
    %cst_144 = arith.constant 2.000000e+00 : f32
    %691 = vector.broadcast %cst_144 : f32 to vector<8x128xf32>
    %692 = arith.mulf %691, %679 : vector<8x128xf32>
    %693 = arith.addf %690, %692 : vector<8x128xf32>
    %694 = arith.mulf %683, %673 : vector<8x128xf32>
    %695 = arith.addf %636, %694 : vector<8x128xf32>
    %cst_145 = arith.constant 2.000000e+00 : f32
    %696 = vector.broadcast %cst_145 : f32 to vector<8x128xf32>
    %697 = arith.mulf %696, %682 : vector<8x128xf32>
    %698 = arith.addf %695, %697 : vector<8x128xf32>
    %699 = arith.mulf %662, %664 : vector<8x128xf32>
    %700 = arith.mulf %660, %663 : vector<8x128xf32>
    %701 = arith.subf %699, %700 : vector<8x128xf32>
    %cst_146 = arith.constant -1.962000e+01 : f32
    %702 = vector.broadcast %cst_146 : f32 to vector<8x128xf32>
    %703 = arith.mulf %702, %701 : vector<8x128xf32>
    %704 = arith.mulf %663, %664 : vector<8x128xf32>
    %705 = arith.mulf %660, %662 : vector<8x128xf32>
    %706 = arith.addf %704, %705 : vector<8x128xf32>
    %cst_147 = arith.constant -1.962000e+01 : f32
    %707 = vector.broadcast %cst_147 : f32 to vector<8x128xf32>
    %708 = arith.mulf %707, %706 : vector<8x128xf32>
    %709 = arith.mulf %662, %662 : vector<8x128xf32>
    %710 = arith.mulf %663, %663 : vector<8x128xf32>
    %711 = arith.addf %709, %710 : vector<8x128xf32>
    %cst_148 = arith.constant -1.962000e+01 : f32
    %712 = vector.broadcast %cst_148 : f32 to vector<8x128xf32>
    %713 = arith.mulf %712, %711 : vector<8x128xf32>
    %cst_149 = arith.constant -9.810000e+00 : f32
    %714 = vector.broadcast %cst_149 : f32 to vector<8x128xf32>
    %715 = arith.subf %714, %713 : vector<8x128xf32>
    %716 = arith.mulf %642, %636 : vector<8x128xf32>
    %717 = arith.mulf %645, %633 : vector<8x128xf32>
    %718 = arith.subf %716, %717 : vector<8x128xf32>
    %719 = arith.mulf %645, %630 : vector<8x128xf32>
    %720 = arith.mulf %639, %636 : vector<8x128xf32>
    %721 = arith.subf %719, %720 : vector<8x128xf32>
    %722 = arith.mulf %639, %633 : vector<8x128xf32>
    %723 = arith.mulf %642, %630 : vector<8x128xf32>
    %724 = arith.subf %722, %723 : vector<8x128xf32>
    %725 = arith.subf %703, %718 : vector<8x128xf32>
    %726 = arith.subf %708, %721 : vector<8x128xf32>
    %727 = arith.addf %70, %715 : vector<8x128xf32>
    %728 = arith.subf %727, %724 : vector<8x128xf32>
    %729 = arith.mulf %621, %639 : vector<8x128xf32>
    %730 = arith.mulf %624, %642 : vector<8x128xf32>
    %731 = arith.addf %729, %730 : vector<8x128xf32>
    %732 = arith.mulf %627, %645 : vector<8x128xf32>
    %733 = arith.addf %731, %732 : vector<8x128xf32>
    %734 = arith.mulf %624, %645 : vector<8x128xf32>
    %735 = arith.mulf %627, %642 : vector<8x128xf32>
    %736 = arith.subf %734, %735 : vector<8x128xf32>
    %737 = arith.mulf %627, %639 : vector<8x128xf32>
    %738 = arith.mulf %621, %645 : vector<8x128xf32>
    %739 = arith.subf %737, %738 : vector<8x128xf32>
    %740 = arith.mulf %621, %642 : vector<8x128xf32>
    %741 = arith.mulf %624, %639 : vector<8x128xf32>
    %742 = arith.subf %740, %741 : vector<8x128xf32>
    %cst_150 = arith.constant 2.500000e-01 : f32
    %743 = vector.broadcast %cst_150 : f32 to vector<8x128xf32>
    %744 = arith.mulf %743, %652 : vector<8x128xf32>
    %cst_151 = arith.constant 5.000000e-01 : f32
    %745 = vector.broadcast %cst_151 : f32 to vector<8x128xf32>
    %746 = arith.mulf %745, %733 : vector<8x128xf32>
    %747 = arith.mulf %744, %639 : vector<8x128xf32>
    %cst_152 = arith.constant 5.000000e-01 : f32
    %748 = vector.broadcast %cst_152 : f32 to vector<8x128xf32>
    %749 = arith.mulf %748, %736 : vector<8x128xf32>
    %750 = arith.addf %747, %749 : vector<8x128xf32>
    %751 = arith.mulf %746, %621 : vector<8x128xf32>
    %752 = arith.addf %750, %751 : vector<8x128xf32>
    %753 = arith.mulf %744, %642 : vector<8x128xf32>
    %cst_153 = arith.constant 5.000000e-01 : f32
    %754 = vector.broadcast %cst_153 : f32 to vector<8x128xf32>
    %755 = arith.mulf %754, %739 : vector<8x128xf32>
    %756 = arith.addf %753, %755 : vector<8x128xf32>
    %757 = arith.mulf %746, %624 : vector<8x128xf32>
    %758 = arith.addf %756, %757 : vector<8x128xf32>
    %759 = arith.mulf %744, %645 : vector<8x128xf32>
    %cst_154 = arith.constant 5.000000e-01 : f32
    %760 = vector.broadcast %cst_154 : f32 to vector<8x128xf32>
    %761 = arith.mulf %760, %742 : vector<8x128xf32>
    %762 = arith.addf %759, %761 : vector<8x128xf32>
    %763 = arith.mulf %746, %627 : vector<8x128xf32>
    %764 = arith.addf %762, %763 : vector<8x128xf32>
    %cst_155 = arith.constant 0.0156608894 : f32
    %765 = vector.broadcast %cst_155 : f32 to vector<8x128xf32>
    %766 = arith.mulf %765, %639 : vector<8x128xf32>
    %cst_156 = arith.constant 3.180370e-06 : f32
    %767 = vector.broadcast %cst_156 : f32 to vector<8x128xf32>
    %768 = arith.mulf %767, %642 : vector<8x128xf32>
    %769 = arith.addf %766, %768 : vector<8x128xf32>
    %cst_157 = arith.constant 3.180370e-06 : f32
    %770 = vector.broadcast %cst_157 : f32 to vector<8x128xf32>
    %771 = arith.mulf %770, %639 : vector<8x128xf32>
    %cst_158 = arith.constant 0.0156207802 : f32
    %772 = vector.broadcast %cst_158 : f32 to vector<8x128xf32>
    %773 = arith.mulf %772, %642 : vector<8x128xf32>
    %774 = arith.addf %771, %773 : vector<8x128xf32>
    %cst_159 = arith.constant 0.0222686809 : f32
    %775 = vector.broadcast %cst_159 : f32 to vector<8x128xf32>
    %776 = arith.mulf %775, %645 : vector<8x128xf32>
    %777 = arith.mulf %642, %776 : vector<8x128xf32>
    %778 = arith.mulf %645, %774 : vector<8x128xf32>
    %779 = arith.subf %777, %778 : vector<8x128xf32>
    %780 = arith.mulf %645, %769 : vector<8x128xf32>
    %781 = arith.mulf %639, %776 : vector<8x128xf32>
    %782 = arith.subf %780, %781 : vector<8x128xf32>
    %783 = arith.mulf %639, %774 : vector<8x128xf32>
    %784 = arith.mulf %642, %769 : vector<8x128xf32>
    %785 = arith.subf %783, %784 : vector<8x128xf32>
    %786 = arith.subf %81, %779 : vector<8x128xf32>
    %787 = arith.subf %94, %782 : vector<8x128xf32>
    %788 = arith.subf %99, %785 : vector<8x128xf32>
    %cst_160 = arith.constant 63.8533363 : f32
    %789 = vector.broadcast %cst_160 : f32 to vector<8x128xf32>
    %790 = arith.mulf %789, %786 : vector<8x128xf32>
    %cst_161 = arith.constant -0.0130004538 : f32
    %791 = vector.broadcast %cst_161 : f32 to vector<8x128xf32>
    %792 = arith.mulf %791, %787 : vector<8x128xf32>
    %793 = arith.addf %790, %792 : vector<8x128xf32>
    %cst_162 = arith.constant -0.0130004538 : f32
    %794 = vector.broadcast %cst_162 : f32 to vector<8x128xf32>
    %795 = arith.mulf %794, %786 : vector<8x128xf32>
    %cst_163 = arith.constant 64.0172882 : f32
    %796 = vector.broadcast %cst_163 : f32 to vector<8x128xf32>
    %797 = arith.mulf %796, %787 : vector<8x128xf32>
    %798 = arith.addf %795, %797 : vector<8x128xf32>
    %cst_164 = arith.constant 44.9061165 : f32
    %799 = vector.broadcast %cst_164 : f32 to vector<8x128xf32>
    %800 = arith.mulf %799, %788 : vector<8x128xf32>
    %cst_165 = arith.constant 2.000000e+00 : f32
    %801 = vector.broadcast %cst_165 : f32 to vector<8x128xf32>
    %802 = arith.mulf %801, %324 : vector<8x128xf32>
    %803 = arith.addf %142, %802 : vector<8x128xf32>
    %cst_166 = arith.constant 2.000000e+00 : f32
    %804 = vector.broadcast %cst_166 : f32 to vector<8x128xf32>
    %805 = arith.mulf %804, %506 : vector<8x128xf32>
    %806 = arith.addf %803, %805 : vector<8x128xf32>
    %807 = arith.addf %806, %688 : vector<8x128xf32>
    %cst_167 = arith.constant 0.00833333377 : f32
    %808 = vector.broadcast %cst_167 : f32 to vector<8x128xf32>
    %809 = arith.mulf %808, %807 : vector<8x128xf32>
    %810 = arith.addf %4, %809 : vector<8x128xf32>
    %cst_168 = arith.constant 2.000000e+00 : f32
    %811 = vector.broadcast %cst_168 : f32 to vector<8x128xf32>
    %812 = arith.mulf %811, %329 : vector<8x128xf32>
    %813 = arith.addf %147, %812 : vector<8x128xf32>
    %cst_169 = arith.constant 2.000000e+00 : f32
    %814 = vector.broadcast %cst_169 : f32 to vector<8x128xf32>
    %815 = arith.mulf %814, %511 : vector<8x128xf32>
    %816 = arith.addf %813, %815 : vector<8x128xf32>
    %817 = arith.addf %816, %693 : vector<8x128xf32>
    %cst_170 = arith.constant 0.00833333377 : f32
    %818 = vector.broadcast %cst_170 : f32 to vector<8x128xf32>
    %819 = arith.mulf %818, %817 : vector<8x128xf32>
    %820 = arith.addf %7, %819 : vector<8x128xf32>
    %cst_171 = arith.constant 2.000000e+00 : f32
    %821 = vector.broadcast %cst_171 : f32 to vector<8x128xf32>
    %822 = arith.mulf %821, %334 : vector<8x128xf32>
    %823 = arith.addf %152, %822 : vector<8x128xf32>
    %cst_172 = arith.constant 2.000000e+00 : f32
    %824 = vector.broadcast %cst_172 : f32 to vector<8x128xf32>
    %825 = arith.mulf %824, %516 : vector<8x128xf32>
    %826 = arith.addf %823, %825 : vector<8x128xf32>
    %827 = arith.addf %826, %698 : vector<8x128xf32>
    %cst_173 = arith.constant 0.00833333377 : f32
    %828 = vector.broadcast %cst_173 : f32 to vector<8x128xf32>
    %829 = arith.mulf %828, %827 : vector<8x128xf32>
    %830 = arith.addf %10, %829 : vector<8x128xf32>
    %cst_174 = arith.constant 2.000000e+00 : f32
    %831 = vector.broadcast %cst_174 : f32 to vector<8x128xf32>
    %832 = arith.mulf %831, %388 : vector<8x128xf32>
    %833 = arith.addf %206, %832 : vector<8x128xf32>
    %cst_175 = arith.constant 2.000000e+00 : f32
    %834 = vector.broadcast %cst_175 : f32 to vector<8x128xf32>
    %835 = arith.mulf %834, %570 : vector<8x128xf32>
    %836 = arith.addf %833, %835 : vector<8x128xf32>
    %837 = arith.addf %836, %752 : vector<8x128xf32>
    %cst_176 = arith.constant 0.00833333377 : f32
    %838 = vector.broadcast %cst_176 : f32 to vector<8x128xf32>
    %839 = arith.mulf %838, %837 : vector<8x128xf32>
    %840 = arith.addf %13, %839 : vector<8x128xf32>
    %cst_177 = arith.constant 2.000000e+00 : f32
    %841 = vector.broadcast %cst_177 : f32 to vector<8x128xf32>
    %842 = arith.mulf %841, %394 : vector<8x128xf32>
    %843 = arith.addf %212, %842 : vector<8x128xf32>
    %cst_178 = arith.constant 2.000000e+00 : f32
    %844 = vector.broadcast %cst_178 : f32 to vector<8x128xf32>
    %845 = arith.mulf %844, %576 : vector<8x128xf32>
    %846 = arith.addf %843, %845 : vector<8x128xf32>
    %847 = arith.addf %846, %758 : vector<8x128xf32>
    %cst_179 = arith.constant 0.00833333377 : f32
    %848 = vector.broadcast %cst_179 : f32 to vector<8x128xf32>
    %849 = arith.mulf %848, %847 : vector<8x128xf32>
    %850 = arith.addf %16, %849 : vector<8x128xf32>
    %cst_180 = arith.constant 2.000000e+00 : f32
    %851 = vector.broadcast %cst_180 : f32 to vector<8x128xf32>
    %852 = arith.mulf %851, %400 : vector<8x128xf32>
    %853 = arith.addf %218, %852 : vector<8x128xf32>
    %cst_181 = arith.constant 2.000000e+00 : f32
    %854 = vector.broadcast %cst_181 : f32 to vector<8x128xf32>
    %855 = arith.mulf %854, %582 : vector<8x128xf32>
    %856 = arith.addf %853, %855 : vector<8x128xf32>
    %857 = arith.addf %856, %764 : vector<8x128xf32>
    %cst_182 = arith.constant 0.00833333377 : f32
    %858 = vector.broadcast %cst_182 : f32 to vector<8x128xf32>
    %859 = arith.mulf %858, %857 : vector<8x128xf32>
    %860 = arith.addf %19, %859 : vector<8x128xf32>
    %cst_183 = arith.constant 2.000000e+00 : f32
    %861 = vector.broadcast %cst_183 : f32 to vector<8x128xf32>
    %862 = arith.mulf %861, %361 : vector<8x128xf32>
    %863 = arith.addf %179, %862 : vector<8x128xf32>
    %cst_184 = arith.constant 2.000000e+00 : f32
    %864 = vector.broadcast %cst_184 : f32 to vector<8x128xf32>
    %865 = arith.mulf %864, %543 : vector<8x128xf32>
    %866 = arith.addf %863, %865 : vector<8x128xf32>
    %867 = arith.addf %866, %725 : vector<8x128xf32>
    %cst_185 = arith.constant 0.00833333377 : f32
    %868 = vector.broadcast %cst_185 : f32 to vector<8x128xf32>
    %869 = arith.mulf %868, %867 : vector<8x128xf32>
    %870 = arith.addf %22, %869 : vector<8x128xf32>
    %cst_186 = arith.constant 2.000000e+00 : f32
    %871 = vector.broadcast %cst_186 : f32 to vector<8x128xf32>
    %872 = arith.mulf %871, %362 : vector<8x128xf32>
    %873 = arith.addf %180, %872 : vector<8x128xf32>
    %cst_187 = arith.constant 2.000000e+00 : f32
    %874 = vector.broadcast %cst_187 : f32 to vector<8x128xf32>
    %875 = arith.mulf %874, %544 : vector<8x128xf32>
    %876 = arith.addf %873, %875 : vector<8x128xf32>
    %877 = arith.addf %876, %726 : vector<8x128xf32>
    %cst_188 = arith.constant 0.00833333377 : f32
    %878 = vector.broadcast %cst_188 : f32 to vector<8x128xf32>
    %879 = arith.mulf %878, %877 : vector<8x128xf32>
    %880 = arith.addf %25, %879 : vector<8x128xf32>
    %cst_189 = arith.constant 2.000000e+00 : f32
    %881 = vector.broadcast %cst_189 : f32 to vector<8x128xf32>
    %882 = arith.mulf %881, %364 : vector<8x128xf32>
    %883 = arith.addf %182, %882 : vector<8x128xf32>
    %cst_190 = arith.constant 2.000000e+00 : f32
    %884 = vector.broadcast %cst_190 : f32 to vector<8x128xf32>
    %885 = arith.mulf %884, %546 : vector<8x128xf32>
    %886 = arith.addf %883, %885 : vector<8x128xf32>
    %887 = arith.addf %886, %728 : vector<8x128xf32>
    %cst_191 = arith.constant 0.00833333377 : f32
    %888 = vector.broadcast %cst_191 : f32 to vector<8x128xf32>
    %889 = arith.mulf %888, %887 : vector<8x128xf32>
    %890 = arith.addf %28, %889 : vector<8x128xf32>
    %cst_192 = arith.constant 2.000000e+00 : f32
    %891 = vector.broadcast %cst_192 : f32 to vector<8x128xf32>
    %892 = arith.mulf %891, %429 : vector<8x128xf32>
    %893 = arith.addf %247, %892 : vector<8x128xf32>
    %cst_193 = arith.constant 2.000000e+00 : f32
    %894 = vector.broadcast %cst_193 : f32 to vector<8x128xf32>
    %895 = arith.mulf %894, %611 : vector<8x128xf32>
    %896 = arith.addf %893, %895 : vector<8x128xf32>
    %897 = arith.addf %896, %793 : vector<8x128xf32>
    %cst_194 = arith.constant 0.00833333377 : f32
    %898 = vector.broadcast %cst_194 : f32 to vector<8x128xf32>
    %899 = arith.mulf %898, %897 : vector<8x128xf32>
    %900 = arith.addf %31, %899 : vector<8x128xf32>
    %cst_195 = arith.constant 2.000000e+00 : f32
    %901 = vector.broadcast %cst_195 : f32 to vector<8x128xf32>
    %902 = arith.mulf %901, %434 : vector<8x128xf32>
    %903 = arith.addf %252, %902 : vector<8x128xf32>
    %cst_196 = arith.constant 2.000000e+00 : f32
    %904 = vector.broadcast %cst_196 : f32 to vector<8x128xf32>
    %905 = arith.mulf %904, %616 : vector<8x128xf32>
    %906 = arith.addf %903, %905 : vector<8x128xf32>
    %907 = arith.addf %906, %798 : vector<8x128xf32>
    %cst_197 = arith.constant 0.00833333377 : f32
    %908 = vector.broadcast %cst_197 : f32 to vector<8x128xf32>
    %909 = arith.mulf %908, %907 : vector<8x128xf32>
    %910 = arith.addf %34, %909 : vector<8x128xf32>
    %cst_198 = arith.constant 2.000000e+00 : f32
    %911 = vector.broadcast %cst_198 : f32 to vector<8x128xf32>
    %912 = arith.mulf %911, %436 : vector<8x128xf32>
    %913 = arith.addf %254, %912 : vector<8x128xf32>
    %cst_199 = arith.constant 2.000000e+00 : f32
    %914 = vector.broadcast %cst_199 : f32 to vector<8x128xf32>
    %915 = arith.mulf %914, %618 : vector<8x128xf32>
    %916 = arith.addf %913, %915 : vector<8x128xf32>
    %917 = arith.addf %916, %800 : vector<8x128xf32>
    %cst_200 = arith.constant 0.00833333377 : f32
    %918 = vector.broadcast %cst_200 : f32 to vector<8x128xf32>
    %919 = arith.mulf %918, %917 : vector<8x128xf32>
    %920 = arith.addf %37, %919 : vector<8x128xf32>
    %c0_201 = arith.constant 0 : index
    %921 = arith.index_cast %1 : i32 to index
    %c0_202 = arith.constant 0 : index
    %922 = vector.load %arg3[%c0_201, %921, %c0_202] : memref<12x8x128xf32, #tpu.memory_space<vmem>>, vector<1x8x128xf32>
    %923 = vector.shape_cast %922 : vector<1x8x128xf32> to vector<8x128xf32>
    %924 = vector.shape_cast %810 : vector<8x128xf32> to vector<1x8x128xf32>
    tpu.vector_store %arg3[%c0_201, %921, %c0_202], %924 {strides = array<i32>} : memref<12x8x128xf32, #tpu.memory_space<vmem>>, vector<1x8x128xf32>,
    %c1_203 = arith.constant 1 : index
    %925 = arith.index_cast %1 : i32 to index
    %c0_204 = arith.constant 0 : index
    %926 = vector.load %arg3[%c1_203, %925, %c0_204] : memref<12x8x128xf32, #tpu.memory_space<vmem>>, vector<1x8x128xf32>
    %927 = vector.shape_cast %926 : vector<1x8x128xf32> to vector<8x128xf32>
    %928 = vector.shape_cast %820 : vector<8x128xf32> to vector<1x8x128xf32>
    tpu.vector_store %arg3[%c1_203, %925, %c0_204], %928 {strides = array<i32>} : memref<12x8x128xf32, #tpu.memory_space<vmem>>, vector<1x8x128xf32>,
    %c2_205 = arith.constant 2 : index
    %929 = arith.index_cast %1 : i32 to index
    %c0_206 = arith.constant 0 : index
    %930 = vector.load %arg3[%c2_205, %929, %c0_206] : memref<12x8x128xf32, #tpu.memory_space<vmem>>, vector<1x8x128xf32>
    %931 = vector.shape_cast %930 : vector<1x8x128xf32> to vector<8x128xf32>
    %932 = vector.shape_cast %830 : vector<8x128xf32> to vector<1x8x128xf32>
    tpu.vector_store %arg3[%c2_205, %929, %c0_206], %932 {strides = array<i32>} : memref<12x8x128xf32, #tpu.memory_space<vmem>>, vector<1x8x128xf32>,
    %c3_207 = arith.constant 3 : index
    %933 = arith.index_cast %1 : i32 to index
    %c0_208 = arith.constant 0 : index
    %934 = vector.load %arg3[%c3_207, %933, %c0_208] : memref<12x8x128xf32, #tpu.memory_space<vmem>>, vector<1x8x128xf32>
    %935 = vector.shape_cast %934 : vector<1x8x128xf32> to vector<8x128xf32>
    %936 = vector.shape_cast %840 : vector<8x128xf32> to vector<1x8x128xf32>
    tpu.vector_store %arg3[%c3_207, %933, %c0_208], %936 {strides = array<i32>} : memref<12x8x128xf32, #tpu.memory_space<vmem>>, vector<1x8x128xf32>,
    %c4_209 = arith.constant 4 : index
    %937 = arith.index_cast %1 : i32 to index
    %c0_210 = arith.constant 0 : index
    %938 = vector.load %arg3[%c4_209, %937, %c0_210] : memref<12x8x128xf32, #tpu.memory_space<vmem>>, vector<1x8x128xf32>
    %939 = vector.shape_cast %938 : vector<1x8x128xf32> to vector<8x128xf32>
    %940 = vector.shape_cast %850 : vector<8x128xf32> to vector<1x8x128xf32>
    tpu.vector_store %arg3[%c4_209, %937, %c0_210], %940 {strides = array<i32>} : memref<12x8x128xf32, #tpu.memory_space<vmem>>, vector<1x8x128xf32>,
    %c5_211 = arith.constant 5 : index
    %941 = arith.index_cast %1 : i32 to index
    %c0_212 = arith.constant 0 : index
    %942 = vector.load %arg3[%c5_211, %941, %c0_212] : memref<12x8x128xf32, #tpu.memory_space<vmem>>, vector<1x8x128xf32>
    %943 = vector.shape_cast %942 : vector<1x8x128xf32> to vector<8x128xf32>
    %944 = vector.shape_cast %860 : vector<8x128xf32> to vector<1x8x128xf32>
    tpu.vector_store %arg3[%c5_211, %941, %c0_212], %944 {strides = array<i32>} : memref<12x8x128xf32, #tpu.memory_space<vmem>>, vector<1x8x128xf32>,
    %c6_213 = arith.constant 6 : index
    %945 = arith.index_cast %1 : i32 to index
    %c0_214 = arith.constant 0 : index
    %946 = vector.load %arg3[%c6_213, %945, %c0_214] : memref<12x8x128xf32, #tpu.memory_space<vmem>>, vector<1x8x128xf32>
    %947 = vector.shape_cast %946 : vector<1x8x128xf32> to vector<8x128xf32>
    %948 = vector.shape_cast %870 : vector<8x128xf32> to vector<1x8x128xf32>
    tpu.vector_store %arg3[%c6_213, %945, %c0_214], %948 {strides = array<i32>} : memref<12x8x128xf32, #tpu.memory_space<vmem>>, vector<1x8x128xf32>,
    %c7_215 = arith.constant 7 : index
    %949 = arith.index_cast %1 : i32 to index
    %c0_216 = arith.constant 0 : index
    %950 = vector.load %arg3[%c7_215, %949, %c0_216] : memref<12x8x128xf32, #tpu.memory_space<vmem>>, vector<1x8x128xf32>
    %951 = vector.shape_cast %950 : vector<1x8x128xf32> to vector<8x128xf32>
    %952 = vector.shape_cast %880 : vector<8x128xf32> to vector<1x8x128xf32>
    tpu.vector_store %arg3[%c7_215, %949, %c0_216], %952 {strides = array<i32>} : memref<12x8x128xf32, #tpu.memory_space<vmem>>, vector<1x8x128xf32>,
    %c8_217 = arith.constant 8 : index
    %953 = arith.index_cast %1 : i32 to index
    %c0_218 = arith.constant 0 : index
    %954 = vector.load %arg3[%c8_217, %953, %c0_218] : memref<12x8x128xf32, #tpu.memory_space<vmem>>, vector<1x8x128xf32>
    %955 = vector.shape_cast %954 : vector<1x8x128xf32> to vector<8x128xf32>
    %956 = vector.shape_cast %890 : vector<8x128xf32> to vector<1x8x128xf32>
    tpu.vector_store %arg3[%c8_217, %953, %c0_218], %956 {strides = array<i32>} : memref<12x8x128xf32, #tpu.memory_space<vmem>>, vector<1x8x128xf32>,
    %c9_219 = arith.constant 9 : index
    %957 = arith.index_cast %1 : i32 to index
    %c0_220 = arith.constant 0 : index
    %958 = vector.load %arg3[%c9_219, %957, %c0_220] : memref<12x8x128xf32, #tpu.memory_space<vmem>>, vector<1x8x128xf32>
    %959 = vector.shape_cast %958 : vector<1x8x128xf32> to vector<8x128xf32>
    %960 = vector.shape_cast %900 : vector<8x128xf32> to vector<1x8x128xf32>
    tpu.vector_store %arg3[%c9_219, %957, %c0_220], %960 {strides = array<i32>} : memref<12x8x128xf32, #tpu.memory_space<vmem>>, vector<1x8x128xf32>,
    %c10_221 = arith.constant 10 : index
    %961 = arith.index_cast %1 : i32 to index
    %c0_222 = arith.constant 0 : index
    %962 = vector.load %arg3[%c10_221, %961, %c0_222] : memref<12x8x128xf32, #tpu.memory_space<vmem>>, vector<1x8x128xf32>
    %963 = vector.shape_cast %962 : vector<1x8x128xf32> to vector<8x128xf32>
    %964 = vector.shape_cast %910 : vector<8x128xf32> to vector<1x8x128xf32>
    tpu.vector_store %arg3[%c10_221, %961, %c0_222], %964 {strides = array<i32>} : memref<12x8x128xf32, #tpu.memory_space<vmem>>, vector<1x8x128xf32>,
    %c11_223 = arith.constant 11 : index
    %965 = arith.index_cast %1 : i32 to index
    %c0_224 = arith.constant 0 : index
    %966 = vector.load %arg3[%c11_223, %965, %c0_224] : memref<12x8x128xf32, #tpu.memory_space<vmem>>, vector<1x8x128xf32>
    %967 = vector.shape_cast %966 : vector<1x8x128xf32> to vector<8x128xf32>
    %968 = vector.shape_cast %920 : vector<8x128xf32> to vector<1x8x128xf32>
    tpu.vector_store %arg3[%c11_223, %965, %c0_224], %968 {strides = array<i32>} : memref<12x8x128xf32, #tpu.memory_space<vmem>>, vector<1x8x128xf32>,
    %c1_i32 = arith.constant 1 : i32
    return
  }
  func.func @transform_0(%arg0: i32) -> (i32, i32, i32) {
    %c0_i32 = arith.constant 0 : i32
    %c0_i32_0 = arith.constant 0 : i32
    %c0_i32_1 = arith.constant 0 : i32
    return %c0_i32, %arg0, %c0_i32_0 : i32, i32, i32
  }
  func.func @transform_1(%arg0: i32) -> (i32, i32, i32) {
    %c0_i32 = arith.constant 0 : i32
    %c0_i32_0 = arith.constant 0 : i32
    %c0_i32_1 = arith.constant 0 : i32
    return %c0_i32, %arg0, %c0_i32_0 : i32, i32, i32
  }
  func.func @transform_2(%arg0: i32) -> (i32, i32, i32) {
    %c0_i32 = arith.constant 0 : i32
    %c0_i32_0 = arith.constant 0 : i32
    %c0_i32_1 = arith.constant 0 : i32
    return %c0_i32, %arg0, %c0_i32_0 : i32, i32, i32
  }
}

</mosaic_0001>

<bundles_post_ra>
// kernel: tpu_custom_call.1
= control target key start
LH: loop header
LB: loop body
LE: loop exit
PB: predicated region body
PF: predicated region fallthrough
CT: control target
= control target key end

     0   :  { %7 = vsyncpa [#allocation3], 0  ;;  %s1799_s0 = inlined_call_operand.hbm [shape: f32[12,8,128], index: 0, kind: input, shape index: {}]   ;;  %s1800_s1 = inlined_call_operand.hbm [shape: f32[4,8,128], index: 1, kind: input, shape index: {}]   ;;  %s1801_s2 = inlined_call_operand.hbm [shape: f32[12,8,128], index: 2, kind: output, shape index: {}]  }
   0x1   :  { %8 = vsyncpa [#allocation6], 0 }
   0x2   :  { %9 = vsyncpa [#allocation4], 0  ;;  %s928_s9 = smov [#allocation2]   ;;  %s856_s13 = scalar_lea.hbm %s1799_s0, 1536 }
   0x3   :  { %s15_s10 = sshll.u32 %s928_s9, 4  ;;  %p857_p0 = scmp.ne.s32.totalorder %s1799_s0, %s856_s13  ;;  %s16_s10 = int_to_ptr.vmem [resolvable:$true] %s15_s10 }
   0x4   :  { %p860_p1 = scmp.lt.u32.totalorder %s856_s13, %s1799_s0 }
   0x6   :  { %p862_p2 = pnand %p860_p1, %p857_p0 }
   0x8   :  { %865 = shalt.err (!%p862_p2)
}
   0x9   :  { %s866_s18 = scalar_lea.vmem %s16_s10, 1536  ;;  %p871_p4 = scmp.lt.s32.totalorder %s16_s10, %s16_s10 }
   0xa   :  { %p867_p3 = scmp.ne.s32.totalorder %s16_s10, %s866_s18  ;;  %p872_p5 = scmp.lt.s32.totalorder %s866_s18, %s866_s18 }
   0xc   :  { %p873_p6 = por %p872_p5, %p871_p4 }
   0xe   :  { %p874_p7 = pnand %p873_p6, %p867_p3 }
  0x10   :  { %877 = shalt.err (!%p874_p7)
}
  0x11   :  { %s929_s19 = smov 128   ;;  %s930_s20 = smov 8  }
  0x12   :  { %21 = dma.hbm_to_vmem [thread:$0]  %s1799_s0, 1536, %s16_s10, [#allocation3], %s929_s19, %s929_s19, %s930_s20  }
  0x13   :  { %s931_s23 = smov [#allocation5]   ;;  %s878_s27 = scalar_lea.hbm %s1800_s1, 512 }
  0x14   :  { %s27_s24 = sshll.u32 %s931_s23, 4  ;;  %p879_p8 = scmp.ne.s32.totalorder %s1800_s1, %s878_s27  ;;  %s28_s24 = int_to_ptr.vmem [resolvable:$true] %s27_s24 }
  0x15   :  { %p882_p9 = scmp.lt.u32.totalorder %s878_s27, %s1800_s1 }
  0x17   :  { %p884_p10 = pnand %p882_p9, %p879_p8 }
  0x19   :  { %887 = shalt.err (!%p884_p10)
}
  0x1a   :  { %s888_s4 = scalar_lea.vmem %s28_s24, 512  ;;  %p893_p12 = scmp.lt.s32.totalorder %s28_s24, %s28_s24 }
  0x1b   :  { %p889_p11 = scmp.ne.s32.totalorder %s28_s24, %s888_s4  ;;  %p894_p13 = scmp.lt.s32.totalorder %s888_s4, %s888_s4 }
  0x1d   :  { %p895_p0 = por %p894_p13, %p893_p12 }
  0x1f   :  { %p896_p1 = pnand %p895_p0, %p889_p11 }
  0x21   :  { %899 = shalt.err (!%p896_p1)
}
  0x22   :  { %33 = dma.hbm_to_vmem [thread:$0]  %s1800_s1, 512, %s28_s24, [#allocation6], %s929_s19, %s929_s19, %s930_s20  }
  0x23   :  { %922 = dma.done.wait [#allocation3], 1536  }
  0x24   :  { %923 = vsyncadd [#allocation3], 4294965760 }
  0x25   :  { %924 = dma.done.wait [#allocation6], 512  }
  0x26   :  { %925 = vsyncadd [#allocation6], 4294966784  ;;  %v978_v0 = vld [vmem:[#allocation2 + $0x18] sm:$0xff]  ;;  %v980_v1 = vld [vmem:[#allocation2 + $0x20] sm:$0xff]  ;;  %s932_s1 = smov [#allocation7]  }
  0x27   :  { %v982_v2 = vld [vmem:[#allocation2 + $0x28] sm:$0xff]  ;;  %v984_v3 = vld [vmem:[#allocation2 + $0x30] sm:$0xff]  ;;  %v986_v4 = vld [vmem:[#allocation2 + $0x38] sm:$0xff]  ;;  %v110_v5 = vmul.f32 %v978_v0, %v978_v0  ;;  %v111_v6 = vmul.f32 %v980_v1, %v980_v1  ;;  %s796_s6 = sshll.u32 %s932_s1, 4  ;;  %s797_s6 = int_to_ptr.vmem [resolvable:$true] %s796_s6 }
  0x28   :  { %v992_v7 = vld [vmem:[#allocation2 + $0x40] sm:$0xff]  ;;  %v994_v8 = vld [vmem:[#allocation2 + $0x48] sm:$0xff]  ;;  %v996_v9 = vld [vmem:[#allocation2 + $0x50] sm:$0xff]  ;;  %v113_v10 = vmul.f32 %v982_v2, %v982_v2  ;;  %s900_s7 = scalar_lea.vmem %s797_s6, 1536  ;;  %p905_p3 = scmp.lt.s32.totalorder %s797_s6, %s797_s6 }
  0x29   :  { %1835 = vst [vmem:[#allocation11_spill] sm:$0xff] %v992_v7  ;;  %1836 = vst [vmem:[#allocation12_spill] sm:$0xff] %v994_v8  ;;  %v1000_v11 = vld [vmem:[#allocation2 + $0x58] sm:$0xff]  ;;  %v74_v12 = vld [vmem:[#allocation5] sm:$0xff]  ;;  %v112_v14 = vadd.f32 %v111_v6, %v110_v5  ;;  %v1004_v15 = vmul.f32 %v996_v9, %v992_v7  ;;  %v1008_v16 = vmul.f32 %v994_v8, %v992_v7  ;;  %p901_p2 = scmp.ne.s32.totalorder %s797_s6, %s900_s7  ;;  %p906_p4 = scmp.lt.s32.totalorder %s900_s7, %s900_s7 }
  0x2a   :  { %1837 = vst [vmem:[#allocation13_spill] sm:$0xff] %v996_v9  ;;  %v76_v13 = vld [vmem:[#allocation5 + $0x8] sm:$0xff]  ;;  %v78_v17 = vld [vmem:[#allocation5 + $0x10] sm:$0xff]  ;;  %v80_v18 = vld [vmem:[#allocation5 + $0x18] sm:$0xff]  ;;  %v81_v19 = vmul.f32 2.44101, %v74_v12  ;;  %v1012_v22 = vmul.f32 %v1000_v11, %v986_v4  ;;  %v1018_v26 = vmul.f32 %v994_v8, %v986_v4  ;;  %v1022_v30 = vmul.f32 %v1000_v11, %v984_v3 }
  0x2b   :  { %v83_v20 = vmul.f32 2.44101, %v76_v13  ;;  %v106_v21 = vsub.f32 %v74_v12, %v76_v13  ;;  %v85_v23 = vmul.f32 2.44101, %v78_v17  ;;  %v87_v24 = vmul.f32 2.44101, %v80_v18  ;;  %p907_p5 = por %p906_p4, %p905_p3 }
  0x2c   :  { %v1014_v25 = vadd.f32 %v113_v10, %v112_v14  ;;  %v82_v27 = vadd.f32 -30.48576, %v81_v19  ;;  %v172_v34 = vsub.f32 %v1004_v15, %v1012_v22  ;;  %v1032_v48 = vmul.f32 %v996_v9, %v984_v3 }
  0x2d   :  { %v84_v28 = vadd.f32 -30.48576, %v83_v20  ;;  %v107_v29 = vadd.f32 %v106_v21, %v78_v17  ;;  %v86_v31 = vadd.f32 -30.48576, %v85_v23  ;;  %v88_v32 = vadd.f32 -30.48576, %v87_v24  ;;  %p908_p6 = pnand %p907_p5, %p901_p2 }
  0x2e   :  { %v116_v33 = vadd.f32 1.0, %v1014_v25  ;;  %v93_v36 = vmul.f32 0.1979899, %v82_v27  ;;  %v115_v42 = vsub.f32 1.0, %v1014_v25  ;;  %v183_v49 = vmul.f32 %v994_v8, %v978_v0 }
  0x2f   :  { %v89_v35 = vadd.f32 %v84_v28, %v82_v27  ;;  %v94_v37 = vmul.f32 -0.1979899, %v84_v28  ;;  %v100_v38 = vmul.f32 0.1979899, %v84_v28  ;;  %v96_v39 = vmul.f32 -0.1979899, %v86_v31 }
  0x30   :  { %v103_v40 = vmul.f32 -0.1979899, %v88_v32  ;;  %v108_v41 = vsub.f32 %v107_v29, %v80_v18  ;;  %839 = vrcp.f32 %v116_v33  ;;  %v98_v46 = vmul.f32 0.1979899, %v88_v32 }
  0x31   :  { %v90_v43 = vadd.f32 %v89_v35, %v86_v31  ;;  %v95_v44 = vadd.f32 %v94_v37, %v93_v36  ;;  %v101_v45 = vadd.f32 %v100_v38, %v93_v36  ;;  %v175_v52 = vsub.f32 %v1022_v30, %v1008_v16 }
  0x32   :  { %v1028_v47 = vmul.f32 0.029958, %v108_v41  ;;  %v184_v53 = vmul.f32 %v996_v9, %v980_v1  ;;  %v186_v55 = vmul.f32 %v1000_v11, %v982_v2  ;;  %v188_v56 = vmul.f32 %v1000_v11, %v980_v1 }
  0x33   :  { %v91_v50 = vadd.f32 %v90_v43, %v88_v32  ;;  %v102_v51 = vadd.f32 %v101_v45, %v96_v39  ;;  %v97_v54 = vadd.f32 %v96_v39, %v95_v44  ;;  %v189_v57 = vmul.f32 %v996_v9, %v982_v2 }
  0x34   :  { %1838 = vst [vmem:[#allocation14_spill] sm:$0xff] %v1028_v47  ;;  %v178_v60 = vsub.f32 %v1018_v26, %v1032_v48  ;;  %v185_v61 = vadd.f32 %v184_v53, %v183_v49  ;;  %v191_v63 = vmul.f32 %v994_v8, %v982_v2  ;;  %v192_v5 = vmul.f32 %v1000_v11, %v978_v0 }
  0x35   :  { %v1046_v58 = vmul.f32 0.5, %v91_v50  ;;  %v104_v59 = vadd.f32 %v103_v40, %v102_v51  ;;  %v190_v62 = vsub.f32 %v188_v56, %v189_v57  ;;  %v194_v6 = vmul.f32 %v996_v9, %v978_v0 }
  0x36   :  { %v187_v12 = vadd.f32 %v186_v55, %v185_v61  ;;  %v195_v13 = vmul.f32 %v994_v8, %v980_v1  ;;  %v197_v14 = vmul.f32 0.25, %v115_v42  ;;  %v193_v17 = vsub.f32 %v191_v63, %v192_v5 }
  0x37   :  { %v1056_v10 = vsub.f32 0.0, %v104_v59  ;;  %v200_v18 = vmul.f32 0.5, %v190_v62  ;;  %v214_v19 = vmul.f32 0.01566089, %v994_v8  ;;  %v215_v20 = vmul.f32 3.18037e-06, %v996_v9 }
  0x38   :  { %v196_v21 = vsub.f32 %v194_v6, %v195_v13  ;;  %v198_v23 = vmul.f32 0.5, %v187_v12  ;;  %v199_v24 = vmul.f32 %v197_v14, %v994_v8  ;;  %v204_v27 = vmul.f32 %v197_v14, %v996_v9 }
  0x39   :  { %1839 = vst [vmem:[#allocation15_spill] sm:$0xff] %v1056_v10  ;;  %v205_v28 = vmul.f32 0.5, %v193_v17  ;;  %v209_v29 = vmul.f32 %v197_v14, %v1000_v11  ;;  %v216_v31 = vadd.f32 %v215_v20, %v214_v19  ;;  %v217_v32 = vmul.f32 3.18037e-06, %v994_v8 }
  0x3a   :  { %v840_v35 = vpop.eup %839  ;;  %v201_v36 = vadd.f32 %v200_v18, %v199_v24  ;;  %v202_v37 = vmul.f32 %v198_v23, %v978_v0  ;;  %v207_v38 = vmul.f32 %v198_v23, %v980_v1  ;;  %v210_v39 = vmul.f32 0.5, %v196_v21 }
  0x3b   :  { %v118_v40 = vmul.f32 %v840_v35, %v116_v33  ;;  %v206_v41 = vadd.f32 %v205_v28, %v204_v27  ;;  %v212_v43 = vmul.f32 %v198_v23, %v982_v2  ;;  %v218_v44 = vmul.f32 0.01562078, %v996_v9 }
  0x3c   :  { %v1072_v45 = vadd.f32 %v202_v37, %v201_v36  ;;  %v211_v49 = vadd.f32 %v210_v39, %v209_v29  ;;  %v220_v50 = vmul.f32 0.02226868, %v1000_v11  ;;  %v224_v51 = vmul.f32 %v216_v31, %v1000_v11 }
  0x3d   :  { %v119_v53 = vsub.f32 2.0, %v118_v40  ;;  %v1076_v55 = vadd.f32 %v207_v38, %v206_v41  ;;  %v219_v56 = vadd.f32 %v218_v44, %v217_v32  ;;  %v228_v57 = vmul.f32 %v216_v31, %v996_v9 }
  0x3e   :  { %1840 = vst [vmem:[#allocation16_spill] sm:$0xff] %v1072_v45  ;;  %v1079_v59 = vadd.f32 %v212_v43, %v211_v49  ;;  %v221_v33 = vmul.f32 %v220_v50, %v996_v9  ;;  %v225_v61 = vmul.f32 %v220_v50, %v994_v8  ;;  %v240_v62 = vmul.f32 0.025, %v1072_v45 }
  0x3f   :  { %1841 = vst [vmem:[#allocation17_spill] sm:$0xff] %v1076_v55  ;;  %v120_v63 = vmul.f32 %v840_v35, %v119_v53  ;;  %v222_v5 = vmul.f32 %v219_v56, %v1000_v11  ;;  %v227_v6 = vmul.f32 %v219_v56, %v994_v8  ;;  %v242_v12 = vmul.f32 0.025, %v1076_v55 }
  0x40   :  { %1842 = vst [vmem:[#allocation18_spill] sm:$0xff] %v1079_v59  ;;  %v1087_v13 = vadd.f32 %v98_v46, %v97_v54  ;;  %v226_v14 = vsub.f32 %v224_v51, %v225_v61  ;;  %v1090_v17 = vadd.f32 %v240_v62, %v978_v0  ;;  %v244_v18 = vmul.f32 0.025, %v1079_v59 }
  0x41   :  { %v121_v19 = vmul.f32 %v120_v63, %v115_v42  ;;  %v122_v20 = vadd.f32 %v120_v63, %v120_v63  ;;  %v223_v21 = vsub.f32 %v221_v33, %v222_v5  ;;  %v229_v23 = vsub.f32 %v227_v6, %v228_v57 }
  0x42   :  { %1843 = vst [vmem:[#allocation19_spill] sm:$0xff] %v1087_v13  ;;  %v231_v24 = vsub.f32 %v1056_v10, %v226_v14  ;;  %v1097_v27 = vadd.f32 %v242_v12, %v980_v1  ;;  %v1100_v46 = vadd.f32 %v244_v18, %v982_v2  ;;  %v258_v54 = vmul.f32 %v1090_v17, %v1090_v17 }
  0x43   :  { %v1105_v28 = vmul.f32 %v122_v20, %v978_v0  ;;  %v1108_v25 = vmul.f32 %v122_v20, %v980_v1  ;;  %v1111_v42 = vmul.f32 %v122_v20, %v982_v2  ;;  %v1113_v29 = vadd.f32 %v121_v19, %v121_v19 }
  0x44   :  { %v230_v31 = vsub.f32 %v1087_v13, %v223_v21  ;;  %v232_v32 = vsub.f32 %v1028_v47, %v229_v23  ;;  %v234_v35 = vmul.f32 -0.013000454, %v231_v24  ;;  %v237_v36 = vmul.f32 64.01729, %v231_v24 }
  0x45   :  { %v126_v37 = vmul.f32 %v1108_v25, %v992_v7  ;;  %v127_v38 = vmul.f32 %v1111_v42, %v986_v4  ;;  %v129_v39 = vmul.f32 %v1111_v42, %v984_v3  ;;  %v130_v40 = vmul.f32 %v1105_v28, %v992_v7 }
  0x46   :  { %v132_v41 = vmul.f32 %v1105_v28, %v986_v4  ;;  %v133_v43 = vmul.f32 %v1108_v25, %v984_v3  ;;  %v157_v44 = vmul.f32 %v1111_v42, %v1105_v28  ;;  %v158_v49 = vmul.f32 %v1108_v25, %v121_v19 }
  0x47   :  { %v1132_v50 = vsub.f32 %v126_v37, %v127_v38  ;;  %v1134_v51 = vsub.f32 %v129_v39, %v130_v40  ;;  %v161_v53 = vmul.f32 %v1111_v42, %v1108_v25  ;;  %v162_v56 = vmul.f32 %v1105_v28, %v121_v19 }
  0x48   :  { %v1139_v57 = vsub.f32 %v132_v41, %v133_v43  ;;  %v159_v33 = vsub.f32 %v157_v44, %v158_v49  ;;  %v165_v61 = vmul.f32 %v1105_v28, %v1105_v28  ;;  %v166_v62 = vmul.f32 %v1108_v25, %v1108_v25 }
  0x49   :  { %v136_v63 = vmul.f32 %v1134_v51, %v1111_v42  ;;  %v145_v5 = vmul.f32 %v1113_v29, %v1132_v50  ;;  %v163_v6 = vadd.f32 %v162_v56, %v161_v53  ;;  %v233_v12 = vmul.f32 63.853336, %v230_v31 }
  0x4a   :  { %v135_v14 = vmul.f32 %v1139_v57, %v1108_v25  ;;  %v160_v18 = vmul.f32 -19.62, %v159_v33  ;;  %v167_v19 = vadd.f32 %v166_v62, %v165_v61  ;;  %v236_v20 = vmul.f32 -0.013000454, %v230_v31 }
  0x4b   :  { %v146_v21 = vadd.f32 %v145_v5, %v984_v3  ;;  %v164_v23 = vmul.f32 -19.62, %v163_v6  ;;  %v1152_v24 = vadd.f32 %v234_v35, %v233_v12  ;;  %v1154_v37 = vmul.f32 44.906116, %v232_v32 }
  0x4c   :  { %v137_v38 = vsub.f32 %v135_v14, %v136_v63  ;;  %v168_v39 = vmul.f32 -19.62, %v167_v19  ;;  %v1159_v40 = vsub.f32 %v160_v18, %v172_v34  ;;  %v1161_v41 = vadd.f32 %v237_v36, %v236_v20 }
  0x4d   :  { %1844 = vst [vmem:[#allocation20_spill] sm:$0xff] %v1152_v24  ;;  %1845 = vst [vmem:[#allocation21_spill] sm:$0xff] %v1154_v37  ;;  %v1166_v31 = vsub.f32 %v164_v23, %v175_v52  ;;  %v252_v43 = vmul.f32 0.025, %v1152_v24  ;;  %v256_v35 = vmul.f32 0.025, %v1154_v37  ;;  %v259_v32 = vmul.f32 %v1097_v27, %v1097_v27 }
  0x4e   :  { %1846 = vst [vmem:[#allocation22_spill] sm:$0xff] %v1159_v40  ;;  %1847 = vst [vmem:[#allocation23_spill] sm:$0xff] %v1161_v41  ;;  %v147_v44 = vmul.f32 2.0, %v137_v38  ;;  %v169_v49 = vsub.f32 -9.81, %v168_v39  ;;  %v261_v22 = vmul.f32 %v1100_v46, %v1100_v46 }
  0x4f   :  { %1848 = vst [vmem:[#allocation24_spill] sm:$0xff] %v1166_v31  ;;  %v246_v15 = vmul.f32 0.025, %v1159_v40  ;;  %v248_v34 = vmul.f32 0.025, %v1166_v31  ;;  %v1177_v16 = vadd.f32 %v252_v43, %v994_v8  ;;  %v1181_v52 = vadd.f32 %v256_v35, %v1000_v11 }
  0x50   :  { %v254_v30 = vmul.f32 0.025, %v1161_v41  ;;  %v1183_v36 = vadd.f32 %v147_v44, %v146_v21  ;;  %v181_v53 = vadd.f32 %v169_v49, %v1046_v58  ;;  %v260_v33 = vadd.f32 %v259_v32, %v258_v54 }
  0x51   :  { %v1187_v56 = vadd.f32 %v246_v15, %v984_v3  ;;  %v1190_v61 = vadd.f32 %v248_v34, %v986_v4  ;;  %v331_v63 = vmul.f32 %v1177_v16, %v1090_v17  ;;  %v334_v5 = vmul.f32 %v1181_v52, %v1100_v46 }
  0x52   :  { %v255_v62 = vadd.f32 %v254_v30, %v996_v9  ;;  %v1200_v6 = vsub.f32 %v181_v53, %v178_v60  ;;  %v1202_v12 = vadd.f32 %v261_v22, %v260_v33  ;;  %v336_v14 = vmul.f32 %v1181_v52, %v1097_v27 }
  0x53   :  { %v1206_v54 = vmul.f32 %v1181_v52, %v1187_v56  ;;  %v1212_v18 = vmul.f32 %v1181_v52, %v1190_v61  ;;  %v1216_v19 = vmul.f32 %v1177_v16, %v1190_v61  ;;  %v339_v43 = vmul.f32 %v1177_v16, %v1100_v46 }
  0x54   :  { %1849 = vst [vmem:[#allocation25_spill] sm:$0xff] %v1200_v6  ;;  %v1219_v26 = vmul.f32 %v255_v62, %v1187_v56  ;;  %v332_v48 = vmul.f32 %v255_v62, %v1097_v27  ;;  %v250_v60 = vmul.f32 0.025, %v1200_v6  ;;  %v1802_v20 = vsub.f32 1.0, %v1202_v12 }
  0x55   :  { %v264_v21 = vadd.f32 1.0, %v1202_v12  ;;  %v337_v23 = vmul.f32 %v255_v62, %v1100_v46  ;;  %v340_v35 = vmul.f32 %v1181_v52, %v1090_v17  ;;  %v342_v49 = vmul.f32 %v255_v62, %v1090_v17 }
  0x56   :  { %v333_v39 = vadd.f32 %v332_v48, %v331_v63  ;;  %v1233_v32 = vadd.f32 %v250_v60, %v992_v7  ;;  %v343_v34 = vmul.f32 %v1177_v16, %v1097_v27  ;;  %v345_v30 = vmul.f32 0.25, %v1802_v20 }
  0x57   :  { %841 = vrcp.f32 %v264_v21  ;;  %v338_v44 = vsub.f32 %v336_v14, %v337_v23  ;;  %v341_v22 = vsub.f32 %v339_v43, %v340_v35  ;;  %v362_v14 = vmul.f32 0.01566089, %v1177_v16 }
  0x58   :  { %1850 = vst [vmem:[#allocation26_spill] sm:$0xff] %v1233_v32  ;;  %v335_v15 = vadd.f32 %v334_v5, %v333_v39  ;;  %v1241_v53 = vmul.f32 %v255_v62, %v1233_v32  ;;  %v1245_v33 = vmul.f32 %v1177_v16, %v1233_v32  ;;  %v344_v48 = vsub.f32 %v342_v49, %v343_v34 }
  0x59   :  { %v348_v63 = vmul.f32 0.5, %v338_v44  ;;  %v347_v5 = vmul.f32 %v345_v30, %v1177_v16  ;;  %v352_v23 = vmul.f32 %v345_v30, %v255_v62  ;;  %v353_v35 = vmul.f32 0.5, %v341_v22 }
  0x5a   :  { %v346_v60 = vmul.f32 0.5, %v335_v15  ;;  %v357_v38 = vmul.f32 %v345_v30, %v1181_v52  ;;  %v358_v41 = vmul.f32 0.5, %v344_v48  ;;  %v363_v34 = vmul.f32 3.18037e-06, %v255_v62 }
  0x5b   :  { %v349_v20 = vadd.f32 %v348_v63, %v347_v5  ;;  %v354_v49 = vadd.f32 %v353_v35, %v352_v23  ;;  %v365_v24 = vmul.f32 3.18037e-06, %v1177_v16  ;;  %v366_v31 = vmul.f32 0.01562078, %v255_v62 }
  0x5c   :  { %v350_v37 = vmul.f32 %v346_v60, %v1090_v17  ;;  %v355_v44 = vmul.f32 %v346_v60, %v1097_v27  ;;  %v360_v15 = vmul.f32 %v346_v60, %v1100_v46  ;;  %v359_v39 = vadd.f32 %v358_v41, %v357_v38 }
  0x5d   :  { %v368_v22 = vmul.f32 0.02226868, %v1181_v52  ;;  %v364_v30 = vadd.f32 %v363_v34, %v362_v14  ;;  %v138_v63 = vmul.f32 %v1132_v50, %v1111_v42  ;;  %v139_v48 = vmul.f32 %v1139_v57, %v1105_v28 }
  0x5e   :  { %v1258_v6 = vadd.f32 %v350_v37, %v349_v20  ;;  %v1261_v43 = vadd.f32 %v355_v44, %v354_v49  ;;  %v1267_v5 = vadd.f32 %v360_v15, %v359_v39  ;;  %v367_v60 = vadd.f32 %v366_v31, %v365_v24 }
  0x5f   :  { %v369_v23 = vmul.f32 %v368_v22, %v255_v62  ;;  %v373_v37 = vmul.f32 %v368_v22, %v1177_v16  ;;  %v372_v41 = vmul.f32 %v364_v30, %v1181_v52  ;;  %v376_v38 = vmul.f32 %v364_v30, %v255_v62 }
  0x60   :  { %1851 = vst [vmem:[#allocation27_spill] sm:$0xff] %v1258_v6  ;;  %1852 = vst [vmem:[#allocation28_spill] sm:$0xff] %v1261_v43  ;;  %v388_v35 = vmul.f32 0.025, %v1258_v6  ;;  %v390_v14 = vmul.f32 0.025, %v1261_v43  ;;  %v370_v42 = vmul.f32 %v367_v60, %v1181_v52  ;;  %v375_v49 = vmul.f32 %v367_v60, %v1177_v16 }
  0x61   :  { %1853 = vst [vmem:[#allocation29_spill] sm:$0xff] %v1267_v5  ;;  %v842_v20 = vpop.eup %841  ;;  %v392_v39 = vmul.f32 0.025, %v1267_v5  ;;  %v374_v15 = vsub.f32 %v372_v41, %v373_v37  ;;  %v140_v34 = vsub.f32 %v138_v63, %v139_v48  ;;  %v149_v60 = vmul.f32 %v1113_v29, %v1134_v51 }
  0x62   :  { %v266_v44 = vmul.f32 %v842_v20, %v264_v21  ;;  %v1277_v24 = vadd.f32 %v388_v35, %v978_v0  ;;  %v1280_v31 = vadd.f32 %v390_v14, %v980_v1  ;;  %v371_v22 = vsub.f32 %v369_v23, %v370_v42 }
  0x63   :  { %v377_v30 = vsub.f32 %v375_v49, %v376_v38  ;;  %v1283_v40 = vadd.f32 %v392_v39, %v982_v2  ;;  %v379_v52 = vsub.f32 %v1056_v10, %v374_v15  ;;  %v1297_v14 = vadd.f32 %v149_v60, %v986_v4 }
  0x64   :  { %v267_v62 = vsub.f32 2.0, %v266_v44  ;;  %v406_v16 = vmul.f32 %v1277_v24, %v1277_v24  ;;  %v407_v21 = vmul.f32 %v1280_v31, %v1280_v31  ;;  %v378_v63 = vsub.f32 %v1087_v13, %v371_v22 }
  0x65   :  { %v380_v48 = vsub.f32 %v1028_v47, %v377_v30  ;;  %v409_v23 = vmul.f32 %v1283_v40, %v1283_v40  ;;  %v382_v41 = vmul.f32 -0.013000454, %v379_v52  ;;  %v385_v38 = vmul.f32 64.01729, %v379_v52 }
  0x66   :  { %v268_v37 = vmul.f32 %v842_v20, %v267_v62  ;;  %v408_v35 = vadd.f32 %v407_v21, %v406_v16  ;;  %v1854_v44 = vsub.f32 1.0, %v1202_v12  ;;  %v381_v39 = vmul.f32 63.853336, %v378_v63 }
  0x67   :  { %v384_v15 = vmul.f32 -0.013000454, %v378_v63  ;;  %v1301_v20 = vmul.f32 44.906116, %v380_v48  ;;  %v1305_v22 = vmul.f32 2.0, %v140_v34  ;;  %v1309_v30 = vmul.f32 %v1134_v51, %v1105_v28 }
  0x68   :  { %v269_v42 = vmul.f32 %v268_v37, %v1854_v44  ;;  %v270_v49 = vadd.f32 %v268_v37, %v268_v37  ;;  %v1303_v62 = vadd.f32 %v409_v23, %v408_v35  ;;  %v1322_v60 = vadd.f32 %v382_v41, %v381_v39 }
  0x69   :  { %1855 = vst [vmem:[#allocation30_spill] sm:$0xff] %v1301_v20  ;;  %1856 = vst [vmem:[#allocation31_spill] sm:$0xff] %v1309_v30  ;;  %v1324_v37 = vadd.f32 %v385_v38, %v384_v15  ;;  %v404_v34 = vmul.f32 0.025, %v1301_v20 }
  0x6a   :  { %v1312_v52 = vmul.f32 %v270_v49, %v1090_v17  ;;  %v1315_v16 = vmul.f32 %v270_v49, %v1097_v27  ;;  %v1318_v12 = vmul.f32 %v270_v49, %v1100_v46  ;;  %v1320_v21 = vadd.f32 %v269_v42, %v269_v42  ;;  %1858 = vst [vmem:[#allocation33_spill] sm:$0xff] %v1322_v60 }
  0x6b   :  { %1859 = vst [vmem:[#allocation34_spill] sm:$0xff] %v1324_v37  ;;  %v1369_v55 = vadd.f32 %v404_v34, %v1000_v11 }
  0x6c   :  { %1857 = vst [vmem:[#allocation32_spill] sm:$0xff] %v1315_v16  ;;  %v274_v17 = vmul.f32 %v1315_v16, %v1233_v32  ;;  %v275_v27 = vmul.f32 %v1318_v12, %v1190_v61  ;;  %v277_v46 = vmul.f32 %v1318_v12, %v1187_v56  ;;  %v278_v51 = vmul.f32 %v1312_v52, %v1233_v32 }
  0x6d   :  { %v280_v63 = vmul.f32 %v1312_v52, %v1190_v61  ;;  %v281_v48 = vmul.f32 %v1315_v16, %v1187_v56  ;;  %v305_v23 = vmul.f32 %v1318_v12, %v1312_v52  ;;  %v306_v41 = vmul.f32 %v1315_v16, %v269_v42 }
  0x6e   :  { %v1343_v38 = vsub.f32 %v274_v17, %v275_v27  ;;  %v1345_v35 = vsub.f32 %v277_v46, %v278_v51  ;;  %v309_v44 = vmul.f32 %v1318_v12, %v1315_v16  ;;  %v310_v49 = vmul.f32 %v1312_v52, %v269_v42 }
  0x6f   :  { %v1350_v39 = vsub.f32 %v280_v63, %v281_v48  ;;  %v307_v15 = vsub.f32 %v305_v23, %v306_v41  ;;  %v313_v28 = vmul.f32 %v1312_v52, %v1312_v52  ;;  %v314_v20 = vmul.f32 %v1315_v16, %v1315_v16 }
  0x70   :  { %v284_v17 = vmul.f32 %v1345_v35, %v1318_v12  ;;  %v293_v27 = vmul.f32 %v1320_v21, %v1343_v38  ;;  %v311_v46 = vadd.f32 %v310_v49, %v309_v44  ;;  %v400_v51 = vmul.f32 0.025, %v1322_v60 }
  0x71   :  { %v283_v42 = vmul.f32 %v1350_v39, %v1315_v16  ;;  %v308_v63 = vmul.f32 -19.62, %v307_v15  ;;  %v315_v48 = vadd.f32 %v314_v20, %v313_v28  ;;  %v402_v23 = vmul.f32 0.025, %v1324_v37 }
  0x72   :  { %v294_v41 = vadd.f32 %v293_v27, %v1187_v56  ;;  %v312_v59 = vmul.f32 -19.62, %v311_v46  ;;  %v1366_v5 = vadd.f32 %v400_v51, %v994_v8  ;;  %v1860_v49 = vsub.f32 %v1241_v53, %v1212_v18 }
  0x73   :  { %v285_v43 = vsub.f32 %v283_v42, %v284_v17  ;;  %v316_v44 = vmul.f32 -19.62, %v315_v48  ;;  %v1377_v20 = vadd.f32 %v402_v23, %v996_v9  ;;  %v1862_v56 = vsub.f32 %v1206_v54, %v1245_v33 }
  0x74   :  { %v1374_v60 = vsub.f32 %v308_v63, %v1860_v49  ;;  %v412_v15 = vadd.f32 1.0, %v1303_v62  ;;  %v479_v11 = vmul.f32 %v1366_v5, %v1277_v24  ;;  %v482_v34 = vmul.f32 %v1369_v55, %v1283_v40 }
  0x75   :  { %v1382_v28 = vsub.f32 %v312_v59, %v1862_v56  ;;  %v295_v17 = vmul.f32 2.0, %v285_v43  ;;  %v317_v18 = vsub.f32 -9.81, %v316_v44  ;;  %v480_v27 = vmul.f32 %v1377_v20, %v1280_v31 }
  0x76   :  { %1861 = vst [vmem:[#allocation35_spill] sm:$0xff] %v1374_v60  ;;  %v394_v53 = vmul.f32 0.025, %v1374_v60  ;;  %843 = vrcp.f32 %v412_v15  ;;  %v484_v59 = vmul.f32 %v1369_v55, %v1280_v31  ;;  %v485_v54 = vmul.f32 %v1377_v20, %v1283_v40 }
  0x77   :  { %1863 = vst [vmem:[#allocation36_spill] sm:$0xff] %v1382_v28  ;;  %v396_v46 = vmul.f32 0.025, %v1382_v28  ;;  %v296_v33 = vadd.f32 %v295_v17, %v294_v41  ;;  %v329_v51 = vadd.f32 %v317_v18, %v1046_v58  ;;  %v481_v42 = vadd.f32 %v480_v27, %v479_v11 }
  0x78   :  { %v1399_v43 = vadd.f32 %v394_v53, %v984_v3  ;;  %v486_v48 = vsub.f32 %v484_v59, %v485_v54  ;;  %v487_v23 = vmul.f32 %v1366_v5, %v1283_v40  ;;  %v488_v44 = vmul.f32 %v1369_v55, %v1277_v24 }
  0x79   :  { %v1402_v63 = vadd.f32 %v396_v46, %v986_v4  ;;  %v1864_v49 = vsub.f32 %v1216_v19, %v1219_v26  ;;  %v483_v17 = vadd.f32 %v482_v34, %v481_v42  ;;  %v490_v26 = vmul.f32 %v1377_v20, %v1277_v24 }
  0x7a   :  { %v1415_v56 = vmul.f32 %v1369_v55, %v1399_v43  ;;  %v1419_v11 = vmul.f32 %v1377_v20, %v1399_v43  ;;  %v489_v19 = vsub.f32 %v487_v23, %v488_v44  ;;  %v491_v46 = vmul.f32 %v1366_v5, %v1280_v31 }
  0x7b   :  { %v1411_v41 = vsub.f32 %v329_v51, %v1864_v49  ;;  %v1423_v18 = vmul.f32 %v1369_v55, %v1402_v63  ;;  %v1427_v53 = vmul.f32 %v1366_v5, %v1402_v63  ;;  %v1866_v59 = vsub.f32 1.0, %v1303_v62 }
  0x7c   :  { %v494_v54 = vmul.f32 0.5, %v483_v17  ;;  %v496_v42 = vmul.f32 0.5, %v486_v48  ;;  %v501_v49 = vmul.f32 0.5, %v489_v19  ;;  %v510_v37 = vmul.f32 0.01566089, %v1366_v5 }
  0x7d   :  { %1865 = vst [vmem:[#allocation37_spill] sm:$0xff] %v1411_v41  ;;  %v398_v27 = vmul.f32 0.025, %v1411_v41  ;;  %v493_v34 = vmul.f32 0.25, %v1866_v59  ;;  %v492_v44 = vsub.f32 %v490_v26, %v491_v46  ;;  %v511_v8 = vmul.f32 3.18037e-06, %v1377_v20 }
  0x7e   :  { %v498_v28 = vmul.f32 %v494_v54, %v1277_v24  ;;  %v503_v59 = vmul.f32 %v494_v54, %v1280_v31  ;;  %v508_v51 = vmul.f32 %v494_v54, %v1283_v40  ;;  %v513_v47 = vmul.f32 3.18037e-06, %v1366_v5 }
  0x7f   :  { %v1440_v23 = vadd.f32 %v398_v27, %v992_v7  ;;  %v495_v41 = vmul.f32 %v493_v34, %v1366_v5  ;;  %v500_v60 = vmul.f32 %v493_v34, %v1377_v20  ;;  %v505_v17 = vmul.f32 %v493_v34, %v1369_v55 }
  0x80   :  { %v506_v27 = vmul.f32 0.5, %v492_v44  ;;  %v844_v46 = vpop.eup %843  ;;  %v514_v34 = vmul.f32 0.01562078, %v1377_v20  ;;  %v516_v44 = vmul.f32 0.02226868, %v1369_v55  ;;  %v684_v7 = vmul.f32 2.0, %v296_v33 }
  0x81   :  { %v1450_v48 = vmul.f32 %v1377_v20, %v1440_v23  ;;  %v1454_v19 = vmul.f32 %v1366_v5, %v1440_v23  ;;  %v497_v26 = vadd.f32 %v496_v42, %v495_v41  ;;  %v502_v45 = vadd.f32 %v501_v49, %v500_v60 }
  0x82   :  { %v414_v6 = vmul.f32 %v844_v46, %v412_v15  ;;  %v507_v41 = vadd.f32 %v506_v27, %v505_v17  ;;  %v1467_v42 = vadd.f32 %v511_v8, %v510_v37  ;;  %v1469_v60 = vadd.f32 %v514_v34, %v513_v47 }
  0x83   :  { %v1463_v32 = vadd.f32 %v498_v28, %v497_v26  ;;  %v1465_v16 = vadd.f32 %v503_v59, %v502_v45  ;;  %v517_v47 = vmul.f32 %v516_v44, %v1377_v20  ;;  %v1490_v59 = vadd.f32 %v684_v7, %v1183_v36 }
  0x84   :  { %v415_v49 = vsub.f32 2.0, %v414_v6  ;;  %v1473_v30 = vadd.f32 %v508_v51, %v507_v41  ;;  %v518_v9 = vmul.f32 %v1469_v60, %v1369_v55  ;;  %v520_v45 = vmul.f32 %v1467_v42, %v1369_v55 }
  0x85   :  { %1867 = vst [vmem:[#allocation38_spill] sm:$0xff] %v1465_v16  ;;  %v536_v15 = vmul.f32 0.05, %v1463_v32  ;;  %v538_v28 = vmul.f32 0.05, %v1465_v16  ;;  %v521_v6 = vmul.f32 %v516_v44, %v1366_v5  ;;  %v1494_v55 = vadd.f32 %v1305_v22, %v1297_v14 }
  0x86   :  { %1868 = vst [vmem:[#allocation39_spill] sm:$0xff] %v1473_v30  ;;  %v416_v8 = vmul.f32 %v844_v46, %v415_v49  ;;  %v540_v51 = vmul.f32 0.05, %v1473_v30  ;;  %v1870_v17 = vsub.f32 1.0, %v1303_v62  ;;  %v519_v46 = vsub.f32 %v517_v47, %v518_v9 }
  0x87   :  { %v1483_v37 = vadd.f32 %v536_v15, %v978_v0  ;;  %v1486_v33 = vadd.f32 %v538_v28, %v980_v1  ;;  %v522_v34 = vsub.f32 %v520_v45, %v521_v6  ;;  %v286_v36 = vmul.f32 %v1343_v38, %v1318_v12 }
  0x88   :  { %v417_v26 = vmul.f32 %v416_v8, %v1870_v17  ;;  %v418_v27 = vadd.f32 %v416_v8, %v416_v8  ;;  %v1499_v0 = vadd.f32 %v540_v51, %v982_v2  ;;  %v526_v2 = vsub.f32 %v1087_v13, %v519_v46 }
  0x89   :  { %1869 = vst [vmem:[#allocation40_spill] sm:$0xff] %v1483_v37  ;;  %v554_v1 = vmul.f32 %v1483_v37, %v1483_v37  ;;  %v555_v7 = vmul.f32 %v1486_v33, %v1486_v33  ;;  %v527_v41 = vsub.f32 %v1056_v10, %v522_v34  ;;  %v1871_v16 = vsub.f32 %v1450_v48, %v1423_v18 }
  0x8a   :  { %v1508_v14 = vmul.f32 %v418_v27, %v1277_v24  ;;  %v1511_v62 = vmul.f32 %v418_v27, %v1280_v31  ;;  %v421_v9 = vmul.f32 %v418_v27, %v1283_v40  ;;  %v1514_v22 = vadd.f32 %v417_v26, %v417_v26 }
  0x8b   :  { %v556_v49 = vadd.f32 %v555_v7, %v554_v1  ;;  %v557_v44 = vmul.f32 %v1499_v0, %v1499_v0  ;;  %v533_v10 = vmul.f32 64.01729, %v527_v41 }
  0x8c   :  { %v422_v12 = vmul.f32 %v1511_v62, %v1440_v23  ;;  %v423_v24 = vmul.f32 %v421_v9, %v1402_v63  ;;  %v425_v31 = vmul.f32 %v421_v9, %v1399_v43  ;;  %v426_v40 = vmul.f32 %v1508_v14, %v1440_v23 }
  0x8d   :  { %v428_v15 = vmul.f32 %v1508_v14, %v1402_v63  ;;  %v429_v45 = vmul.f32 %v1511_v62, %v1399_v43  ;;  %v453_v28 = vmul.f32 %v421_v9, %v1508_v14  ;;  %v454_v8 = vmul.f32 %v1511_v62, %v417_v26 }
  0x8e   :  { %v1532_v47 = vsub.f32 %v422_v12, %v423_v24  ;;  %v427_v6 = vsub.f32 %v425_v31, %v426_v40  ;;  %v457_v51 = vmul.f32 %v421_v9, %v1511_v62  ;;  %v458_v17 = vmul.f32 %v1508_v14, %v417_v26 }
  0x8f   :  { %v1536_v27 = vsub.f32 %v428_v15, %v429_v45  ;;  %v455_v46 = vsub.f32 %v453_v28, %v454_v8  ;;  %v461_v34 = vmul.f32 %v1508_v14, %v1508_v14  ;;  %v462_v1 = vmul.f32 %v1511_v62, %v1511_v62 }
  0x90   :  { %v432_v7 = vmul.f32 %v427_v6, %v421_v9  ;;  %v441_v54 = vmul.f32 %v1514_v22, %v1532_v47  ;;  %v459_v12 = vadd.f32 %v458_v17, %v457_v51  ;;  %v1544_v24 = vmul.f32 63.853336, %v526_v2 }
  0x91   :  { %v431_v31 = vmul.f32 %v1536_v27, %v1511_v62  ;;  %v456_v26 = vmul.f32 -19.62, %v455_v46  ;;  %v463_v40 = vadd.f32 %v462_v1, %v461_v34  ;;  %v530_v15 = vmul.f32 -0.013000454, %v527_v41 }
  0x92   :  { %v442_v45 = vadd.f32 %v441_v54, %v1399_v43  ;;  %v460_v28 = vmul.f32 -19.62, %v459_v12  ;;  %v532_v8 = vmul.f32 -0.013000454, %v526_v2  ;;  %v1554_v51 = vadd.f32 %v557_v44, %v556_v49 }
  0x93   :  { %v433_v13 = vsub.f32 %v431_v31, %v432_v7  ;;  %v464_v30 = vmul.f32 -19.62, %v463_v40  ;;  %v1552_v37 = vsub.f32 %v456_v26, %v1871_v16  ;;  %v1872_v17 = vsub.f32 %v1415_v56, %v1454_v19 }
  0x94   :  { %v1561_v34 = vadd.f32 %v533_v10, %v532_v8  ;;  %v287_v43 = vmul.f32 %v1350_v39, %v1312_v52  ;;  %v297_v54 = vmul.f32 %v1320_v21, %v1345_v35  ;;  %v559_v18 = vsub.f32 1.0, %v1554_v51  ;;  %v1874_v8 = vld [vmem:[#allocation31_spill] sm:$0xff] }
  0x95   :  { %v1559_v46 = vsub.f32 %v460_v28, %v1872_v17  ;;  %v443_v2 = vmul.f32 2.0, %v433_v13  ;;  %v465_v41 = vsub.f32 -9.81, %v464_v30  ;;  %v542_v16 = vmul.f32 0.05, %v1552_v37 }
  0x96   :  { %v560_v56 = vadd.f32 1.0, %v1554_v51  ;;  %v288_v19 = vsub.f32 %v286_v36, %v287_v43  ;;  %v298_v10 = vadd.f32 %v297_v54, %v1190_v61  ;;  %v434_v13 = vmul.f32 %v1532_v47, %v421_v9 }
  0x97   :  { %v544_v48 = vmul.f32 0.05, %v1559_v46  ;;  %v444_v49 = vadd.f32 %v443_v2, %v442_v45  ;;  %v477_v44 = vadd.f32 %v465_v41, %v1046_v58  ;;  %v1574_v1 = vadd.f32 %v542_v16, %v984_v3  ;;  %v1876_v2 = vld [vmem:[#allocation32_spill] sm:$0xff] }
  0x98   :  { %845 = vrcp.f32 %v560_v56  ;;  %v299_v7 = vmul.f32 2.0, %v288_v19  ;;  %v435_v12 = vmul.f32 %v1536_v27, %v1508_v14  ;;  %v1873_v36 = vsub.f32 %v1427_v53, %v1419_v11 }
  0x99   :  { %v1578_v30 = vadd.f32 %v544_v48, %v986_v4  ;;  %v686_v31 = vmul.f32 2.0, %v444_v49  ;;  %v445_v26 = vmul.f32 %v1514_v22, %v427_v6  ;;  %v142_v3 = vmul.f32 %v1132_v50, %v1108_v25  ;;  %v1875_v25 = vld [vmem:[#allocation11_spill] sm:$0xff] }
  0x9a   :  { %v1585_v61 = vsub.f32 %v477_v44, %v1873_v36  ;;  %v300_v9 = vadd.f32 %v299_v7, %v298_v10  ;;  %v436_v40 = vsub.f32 %v434_v13, %v435_v12  ;;  %v153_v4 = vmul.f32 %v1113_v29, %v1139_v57  ;;  %v1877_v10 = vld [vmem:[#allocation26_spill] sm:$0xff] }
  0x9b   :  { %v289_v45 = vmul.f32 %v1345_v35, %v1312_v52  ;;  %v1596_v11 = vadd.f32 %v686_v31, %v1490_v59  ;;  %v446_v53 = vadd.f32 %v445_v26, %v1402_v63  ;;  %v143_v17 = vsub.f32 %v1874_v8, %v142_v3  ;;  %v1880_v26 = vld [vmem:[#allocation14_spill] sm:$0xff] }
  0x9c   :  { %v546_v28 = vmul.f32 0.05, %v1585_v61  ;;  %v447_v43 = vmul.f32 2.0, %v436_v40  ;;  %v691_v54 = vmul.f32 2.0, %v300_v9  ;;  %v154_v50 = vadd.f32 %v153_v4, %v1875_v25  ;;  %v1881_v4 = vld [vmem:[#allocation12_spill] sm:$0xff] }
  0x9d   :  { %v290_v41 = vmul.f32 %v1343_v38, %v1876_v2  ;;  %v155_v57 = vmul.f32 2.0, %v143_v17  ;;  %v301_v52 = vmul.f32 %v1320_v21, %v1350_v39  ;;  %v437_v35 = vmul.f32 %v427_v6, %v1508_v14 }
  0x9e   :  { %v1604_v29 = vadd.f32 %v546_v28, %v1875_v25  ;;  %v448_v59 = vadd.f32 %v447_v43, %v446_v53  ;;  %v692_v63 = vadd.f32 %v691_v54, %v1494_v55  ;;  %v438_v48 = vmul.f32 %v1532_v47, %v1511_v62  ;;  %v1882_v43 = vld [vmem:[#allocation16_spill] sm:$0xff] }
  0x9f   :  { %v291_v16 = vsub.f32 %v289_v45, %v290_v41  ;;  %v156_v19 = vadd.f32 %v155_v57, %v154_v50  ;;  %v302_v49 = vadd.f32 %v301_v52, %v1877_v10  ;;  %v449_v38 = vmul.f32 %v1514_v22, %v1536_v27  ;;  %v1883_v50 = vld [vmem:[#allocation40_spill] sm:$0xff] }
  0xa0   :  { %v523_v44 = vmul.f32 %v1469_v60, %v1366_v5  ;;  %v693_v13 = vmul.f32 2.0, %v448_v59  ;;  %v439_v39 = vsub.f32 %v437_v35, %v438_v48  ;;  %v524_v14 = vmul.f32 %v1467_v42, %v1377_v20  ;;  %v1878_v42 = vld [vmem:[#allocation13_spill] sm:$0xff] }
  0xa1   :  { %v303_v21 = vmul.f32 2.0, %v291_v16  ;;  %v450_v55 = vadd.f32 %v449_v38, %v1440_v23  ;;  %v1621_v6 = vadd.f32 %v530_v15, %v1544_v24  ;;  %v550_v62 = vmul.f32 0.05, %v1561_v34  ;;  %v1879_v24 = vld [vmem:[#allocation27_spill] sm:$0xff] }
  0xa2   :  { %v1626_v47 = vmul.f32 0.25, %v559_v18  ;;  %v846_v22 = vpop.eup %845  ;;  %v1628_v27 = vadd.f32 %v693_v13, %v692_v63  ;;  %v451_v60 = vmul.f32 2.0, %v439_v39  ;;  %v525_v7 = vsub.f32 %v523_v44, %v524_v14  ;;  %v1885_v44 = vld [vmem:[#allocation38_spill] sm:$0xff] }
  0xa3   :  { %v304_v5 = vadd.f32 %v303_v21, %v302_v49  ;;  %v562_v12 = vmul.f32 %v846_v22, %v560_v56  ;;  %v548_v20 = vmul.f32 0.05, %v1621_v6  ;;  %v1632_v23 = vadd.f32 %v550_v62, %v1878_v42  ;;  %v1665_v49 = vld [vmem:[#allocation2 + $0x58] sm:$0xff] }
  0xa4   :  { %v705_v15 = vmul.f32 2.0, %v1879_v24  ;;  %v452_v36 = vadd.f32 %v451_v60, %v450_v55  ;;  %v528_v3 = vsub.f32 %v1880_v26, %v525_v7  ;;  %v707_v9 = vmul.f32 2.0, %v1463_v32  ;;  %v1886_v60 = vld [vmem:[#allocation17_spill] sm:$0xff] }
  0xa5   :  { %v698_v31 = vmul.f32 2.0, %v304_v5  ;;  %v563_v40 = vsub.f32 2.0, %v562_v12  ;;  %v1638_v45 = vadd.f32 %v548_v20, %v1881_v4  ;;  %v628_v56 = vmul.f32 %v1632_v23, %v1486_v33 }
  0xa6   :  { %v633_v28 = vmul.f32 %v1632_v23, %v1499_v0  ;;  %v700_v8 = vmul.f32 2.0, %v452_v36  ;;  %v1644_v17 = vmul.f32 44.906116, %v528_v3  ;;  %v706_v54 = vadd.f32 %v705_v15, %v1882_v43 }
  0xa7   :  { %v699_v53 = vadd.f32 %v698_v31, %v156_v19  ;;  %v564_v25 = vmul.f32 %v846_v22, %v563_v40  ;;  %v627_v32 = vmul.f32 %v1638_v45, %v1883_v50  ;;  %v643_v2 = vmul.f32 %v1626_v47, %v1638_v45  ;;  %v1884_v19 = vld [vmem:[#allocation28_spill] sm:$0xff] }
  0xa8   :  { %v635_v41 = vmul.f32 %v1638_v45, %v1499_v0  ;;  %v552_v52 = vmul.f32 0.05, %v1644_v17  ;;  %v1656_v35 = vadd.f32 %v707_v9, %v706_v54  ;;  %v648_v59 = vmul.f32 %v1626_v47, %v1632_v23 }
  0xa9   :  { %v1653_v57 = vadd.f32 %v700_v8, %v699_v53  ;;  %v1662_v63 = vmul.f32 %v564_v25, %v559_v18  ;;  %v566_v16 = vadd.f32 %v564_v25, %v564_v25  ;;  %v629_v48 = vadd.f32 %v628_v56, %v627_v32 }
  0xaa   :  { %v712_v10 = vmul.f32 2.0, %v1884_v19  ;;  %v1668_v38 = vadd.f32 %v1665_v49, %v552_v52  ;;  %v714_v13 = vmul.f32 2.0, %v1885_v44  ;;  %v638_v21 = vmul.f32 %v1632_v23, %v1883_v50 }
  0xab   :  { %v639_v39 = vmul.f32 %v1638_v45, %v1486_v33  ;;  %v1676_v51 = vmul.f32 %v566_v16, %v1883_v50  ;;  %v1679_v18 = vmul.f32 %v566_v16, %v1486_v33  ;;  %v1682_v14 = vmul.f32 %v566_v16, %v1499_v0 }
  0xac   :  { %v588_v55 = vadd.f32 %v1662_v63, %v1662_v63  ;;  %v630_v62 = vmul.f32 %v1668_v38, %v1499_v0  ;;  %v632_v22 = vmul.f32 %v1668_v38, %v1486_v33  ;;  %v636_v5 = vmul.f32 %v1668_v38, %v1883_v50 }
  0xad   :  { %v713_v7 = vadd.f32 %v712_v10, %v1886_v60  ;;  %v570_v12 = vmul.f32 %v1679_v18, %v1604_v29  ;;  %v571_v20 = vmul.f32 %v1682_v14, %v1578_v30  ;;  %v573_v42 = vmul.f32 %v1682_v14, %v1574_v1 }
  0xae   :  { %v574_v24 = vmul.f32 %v1676_v51, %v1604_v29  ;;  %v576_v15 = vmul.f32 %v1676_v51, %v1578_v30  ;;  %v577_v36 = vmul.f32 %v1679_v18, %v1574_v1  ;;  %v631_v31 = vadd.f32 %v630_v62, %v629_v48 }
  0xaf   :  { %v634_v3 = vsub.f32 %v632_v22, %v633_v28  ;;  %v572_v9 = vsub.f32 %v570_v12, %v571_v20  ;;  %v637_v4 = vsub.f32 %v635_v41, %v636_v5  ;;  %v715_v56 = vadd.f32 %v714_v13, %v713_v7 }
  0xb0   :  { %v575_v40 = vsub.f32 %v573_v42, %v574_v24  ;;  %v578_v53 = vsub.f32 %v576_v15, %v577_v36  ;;  %v642_v8 = vmul.f32 0.5, %v631_v31  ;;  %v640_v54 = vsub.f32 %v638_v21, %v639_v39 }
  0xb1   :  { %v644_v43 = vmul.f32 0.5, %v634_v3  ;;  %v589_v32 = vmul.f32 %v588_v55, %v572_v9  ;;  %v582_v52 = vmul.f32 %v572_v9, %v1682_v14  ;;  %v586_v48 = vmul.f32 %v572_v9, %v1679_v18  ;;  %v1887_v3 = vld [vmem:[#allocation29_spill] sm:$0xff] }
  0xb2   :  { %v580_v25 = vmul.f32 %v575_v40, %v1682_v14  ;;  %v593_v16 = vmul.f32 %v588_v55, %v575_v40  ;;  %v579_v19 = vmul.f32 %v578_v53, %v1679_v18  ;;  %v583_v10 = vmul.f32 %v578_v53, %v1676_v51 }
  0xb3   :  { %v585_v28 = vmul.f32 %v575_v40, %v1676_v51  ;;  %v590_v41 = vadd.f32 %v589_v32, %v1574_v1  ;;  %v597_v13 = vmul.f32 %v588_v55, %v578_v53  ;;  %v645_v21 = vadd.f32 %v644_v43, %v643_v2 }
  0xb4   :  { %v594_v44 = vadd.f32 %v593_v16, %v1578_v30  ;;  %v581_v39 = vsub.f32 %v579_v19, %v580_v25  ;;  %v584_v62 = vsub.f32 %v582_v52, %v583_v10  ;;  %v646_v5 = vmul.f32 %v642_v8, %v1883_v50  ;;  %v1888_v25 = vld [vmem:[#allocation18_spill] sm:$0xff]  ;;  %v43_v19 = vld [vmem:[#allocation2 + $0x8] sm:$0xff]  ;;  %v46_v10 = vld [vmem:[#allocation2 + $0x10] sm:$0xff] }
  0xb5   :  { %v587_v22 = vsub.f32 %v585_v28, %v586_v48  ;;  %v598_v60 = vadd.f32 %v597_v13, %v1604_v29  ;;  %v649_v7 = vmul.f32 0.5, %v637_v4  ;;  %v651_v12 = vmul.f32 %v642_v8, %v1486_v33 }
  0xb6   :  { %v653_v20 = vmul.f32 %v1626_v47, %v1668_v38  ;;  %v591_v42 = vmul.f32 2.0, %v581_v39  ;;  %v595_v24 = vmul.f32 2.0, %v584_v62  ;;  %v647_v36 = vadd.f32 %v646_v5, %v645_v21  ;;  %v1889_v47 = vld [vmem:[#allocation39_spill] sm:$0xff]  ;;  %v848_v39 = vld [vmem:[#allocation2 + $0x18] sm:$0xff] }
  0xb7   :  { %v599_v15 = vmul.f32 2.0, %v587_v22  ;;  %v650_v31 = vadd.f32 %v649_v7, %v648_v59  ;;  %v654_v55 = vmul.f32 0.5, %v640_v54  ;;  %v656_v2 = vmul.f32 %v642_v8, %v1499_v0  ;;  %v40_v8 = vld [vmem:[#allocation2] sm:$0xff] }
  0xb8   :  { %v719_v9 = vmul.f32 2.0, %v1887_v3  ;;  %v592_v40 = vadd.f32 %v591_v42, %v590_v41  ;;  %v596_v50 = vadd.f32 %v595_v24, %v594_v44  ;;  %v709_v4 = vadd.f32 %v1656_v35, %v647_v36 }
  0xb9   :  { %v600_v53 = vadd.f32 %v599_v15, %v598_v60  ;;  %v652_v43 = vadd.f32 %v651_v12, %v650_v31  ;;  %v655_v33 = vadd.f32 %v654_v55, %v653_v20  ;;  %v721_v52 = vmul.f32 2.0, %v1889_v47  ;;  %v849_v12 = vld [vmem:[#allocation2 + $0x20] sm:$0xff] }
  0xba   :  { %v720_v32 = vadd.f32 %v719_v9, %v1888_v25  ;;  %v688_v16 = vadd.f32 %v1596_v11, %v592_v40  ;;  %v695_v59 = vadd.f32 %v1628_v27, %v596_v50  ;;  %v710_v0 = vmul.f32 0.008333334, %v709_v4  ;;  %v1890_v15 = vld [vmem:[#allocation35_spill] sm:$0xff]  ;;  %v850_v9 = vld [vmem:[#allocation2 + $0x28] sm:$0xff] }
  0xbb   :  { %v702_v54 = vadd.f32 %v1653_v57, %v600_v53  ;;  %v716_v28 = vadd.f32 %v715_v56, %v652_v43  ;;  %v657_v48 = vadd.f32 %v656_v2, %v655_v33  ;;  %v601_v35 = vmul.f32 %v1682_v14, %v1676_v51  ;;  %v1891_v53 = vld [vmem:[#allocation22_spill] sm:$0xff] }
  0xbc   :  { %v722_v41 = vadd.f32 %v721_v52, %v720_v32  ;;  %v689_v44 = vmul.f32 0.008333334, %v688_v16  ;;  %v696_v13 = vmul.f32 0.008333334, %v695_v59  ;;  %v711_v62 = vadd.f32 %v848_v39, %v710_v0  ;;  %v1893_v0 = vld [vmem:[#allocation24_spill] sm:$0xff] }
  0xbd   :  { %v703_v21 = vmul.f32 0.008333334, %v702_v54  ;;  %v717_v11 = vmul.f32 0.008333334, %v716_v28  ;;  %v602_v27 = vmul.f32 %v1679_v18, %v1662_v63  ;;  %v614_v57 = vmul.f32 %v1632_v23, %v1604_v29  ;;  %v1894_v28 = vld [vmem:[#allocation37_spill] sm:$0xff] }
  0xbe   :  { %v723_v22 = vadd.f32 %v722_v41, %v657_v48  ;;  %v690_v5 = vadd.f32 %v689_v44, %v40_v8  ;;  %v697_v56 = vadd.f32 %v696_v13, %v43_v19  ;;  %774 = vst [vmem:[#allocation7 + $0x18] sm:$0xff] %v711_v62  ;;  %v615_v7 = vmul.f32 %v1668_v38, %v1578_v30  ;;  %v1895_v13 = vld [vmem:[#allocation25_spill] sm:$0xff] }
  0xbf   :  { %v704_v60 = vadd.f32 %v703_v21, %v46_v10  ;;  %v718_v20 = vadd.f32 %v849_v12, %v717_v11  ;;  %v603_v24 = vsub.f32 %v601_v35, %v602_v27  ;;  %v726_v36 = vmul.f32 2.0, %v1890_v15 }
  0xc0   :  { %v724_v42 = vmul.f32 0.008333334, %v723_v22  ;;  %768 = vst [vmem:[#allocation7] sm:$0xff] %v690_v5  ;;  %770 = vst [vmem:[#allocation7 + $0x8] sm:$0xff] %v697_v56  ;;  %v616_v31 = vsub.f32 %v614_v57, %v615_v7  ;;  %v728_v55 = vmul.f32 2.0, %v1552_v37  ;;  %v605_v2 = vmul.f32 %v1682_v14, %v1679_v18  ;;  %v1892_v37 = vld [vmem:[#allocation36_spill] sm:$0xff] }
  0xc1   :  { %772 = vst [vmem:[#allocation7 + $0x10] sm:$0xff] %v704_v60  ;;  %v606_v3 = vmul.f32 %v1676_v51, %v1662_v63  ;;  %776 = vst [vmem:[#allocation7 + $0x20] sm:$0xff] %v718_v20  ;;  %v604_v50 = vmul.f32 -19.62, %v603_v24  ;;  %v727_v4 = vadd.f32 %v726_v36, %v1891_v53  ;;  %v617_v43 = vmul.f32 %v1668_v38, %v1574_v1  ;;  %v1896_v20 = vld [vmem:[#allocation33_spill] sm:$0xff] }
  0xc2   :  { %v725_v40 = vadd.f32 %v850_v9, %v724_v42  ;;  %v618_v25 = vmul.f32 %v1638_v45, %v1604_v29  ;;  %v733_v32 = vmul.f32 2.0, %v1892_v37  ;;  %v735_v14 = vmul.f32 2.0, %v1559_v46 }
  0xc3   :  { %v607_v33 = vadd.f32 %v606_v3, %v605_v2  ;;  %v623_v47 = vsub.f32 %v604_v50, %v616_v31  ;;  %v729_v63 = vadd.f32 %v728_v55, %v727_v4  ;;  %v609_v52 = vmul.f32 %v1676_v51, %v1676_v51  ;;  %v852_v31 = vld [vmem:[#allocation2 + $0x38] sm:$0xff]  ;;  %v1897_v50 = vld [vmem:[#allocation20_spill] sm:$0xff] }
  0xc4   :  { %778 = vst [vmem:[#allocation7 + $0x28] sm:$0xff] %v725_v40  ;;  %v610_v16 = vmul.f32 %v1679_v18, %v1679_v18  ;;  %v619_v54 = vsub.f32 %v617_v43, %v618_v25  ;;  %v734_v8 = vadd.f32 %v733_v32, %v1893_v0  ;;  %v620_v29 = vmul.f32 %v1638_v45, %v1578_v30  ;;  %v1898_v4 = vld [vmem:[#allocation34_spill] sm:$0xff] }
  0xc5   :  { %v608_v59 = vmul.f32 -19.62, %v607_v33  ;;  %v730_v19 = vadd.f32 %v729_v63, %v623_v47  ;;  %v621_v46 = vmul.f32 %v1632_v23, %v1574_v1  ;;  %v740_v48 = vmul.f32 2.0, %v1894_v28  ;;  %v851_v1 = vld [vmem:[#allocation2 + $0x30] sm:$0xff]  ;;  %v1899_v47 = vld [vmem:[#allocation23_spill] sm:$0xff] }
  0xc6   :  { %v611_v10 = vadd.f32 %v610_v16, %v609_v52  ;;  %v736_v35 = vadd.f32 %v735_v14, %v734_v8  ;;  %v658_v51 = vmul.f32 0.01566089, %v1638_v45  ;;  %v742_v39 = vmul.f32 2.0, %v1585_v61  ;;  %v1901_v16 = vld [vmem:[#allocation19_spill] sm:$0xff] }
  0xc7   :  { %v624_v41 = vsub.f32 %v608_v59, %v619_v54  ;;  %v731_v44 = vmul.f32 0.008333334, %v730_v19  ;;  %v741_v21 = vadd.f32 %v740_v48, %v1895_v13  ;;  %v659_v30 = vmul.f32 3.18037e-06, %v1632_v23  ;;  %v1902_v54 = vld [vmem:[#allocation15_spill] sm:$0xff]  ;;  %v1903_v19 = vld [vmem:[#allocation21_spill] sm:$0xff] }
  0xc8   :  { %v612_v18 = vmul.f32 -19.62, %v611_v10  ;;  %v661_v11 = vmul.f32 3.18037e-06, %v1638_v45  ;;  %v662_v22 = vmul.f32 0.01562078, %v1632_v23  ;;  %v622_v5 = vsub.f32 %v620_v29, %v621_v46 }
  0xc9   :  { %v737_v62 = vadd.f32 %v736_v35, %v624_v41  ;;  %v732_v27 = vadd.f32 %v851_v1, %v731_v44  ;;  %v664_v56 = vmul.f32 0.02226868, %v1668_v38  ;;  %v660_v7 = vadd.f32 %v659_v30, %v658_v51  ;;  %v853_v48 = vld [vmem:[#allocation2 + $0x40] sm:$0xff]  ;;  %v854_v1 = vld [vmem:[#allocation2 + $0x48] sm:$0xff] }
  0xca   :  { %v613_v57 = vsub.f32 -9.81, %v612_v18  ;;  %v663_v12 = vadd.f32 %v662_v22, %v661_v11  ;;  %v747_v42 = vmul.f32 2.0, %v1896_v20  ;;  %v743_v24 = vadd.f32 %v742_v39, %v741_v21 }
  0xcb   :  { %v738_v60 = vmul.f32 0.008333334, %v737_v62  ;;  %780 = vst [vmem:[#allocation7 + $0x30] sm:$0xff] %v732_v27  ;;  %v665_v15 = vmul.f32 %v664_v56, %v1632_v23  ;;  %v669_v36 = vmul.f32 %v664_v56, %v1638_v45  ;;  %v668_v3 = vmul.f32 %v660_v7, %v1668_v38 }
  0xcc   :  { %v625_v61 = vadd.f32 %v613_v57, %v1046_v58  ;;  %v666_v2 = vmul.f32 %v663_v12, %v1668_v38  ;;  %v749_v9 = vmul.f32 2.0, %v1621_v6  ;;  %v748_v53 = vadd.f32 %v747_v42, %v1897_v50  ;;  %v1900_v38 = vld [vmem:[#allocation30_spill] sm:$0xff]  ;;  %v855_v57 = vld [vmem:[#allocation2 + $0x50] sm:$0xff] }
  0xcd   :  { %v739_v55 = vadd.f32 %v852_v31, %v738_v60  ;;  %v754_v43 = vmul.f32 2.0, %v1898_v4  ;;  %v671_v58 = vmul.f32 %v663_v12, %v1638_v45  ;;  %v670_v25 = vsub.f32 %v668_v3, %v669_v36 }
  0xce   :  { %v626_v40 = vsub.f32 %v625_v61, %v622_v5  ;;  %v667_v33 = vsub.f32 %v665_v15, %v666_v2  ;;  %v756_v37 = vmul.f32 2.0, %v1561_v34  ;;  %v672_v32 = vmul.f32 %v660_v7, %v1632_v23 }
  0xcf   :  { %782 = vst [vmem:[#allocation7 + $0x38] sm:$0xff] %v739_v55  ;;  %v755_v63 = vadd.f32 %v754_v43, %v1899_v47  ;;  %v761_v52 = vmul.f32 2.0, %v1900_v38  ;;  %v763_v6 = vmul.f32 2.0, %v1644_v17  ;;  %v675_v0 = vsub.f32 %v1902_v54, %v670_v25 }
  0xd0   :  { %v744_v14 = vadd.f32 %v743_v24, %v626_v40  ;;  %v674_v59 = vsub.f32 %v1901_v16, %v667_v33  ;;  %v673_v8 = vsub.f32 %v671_v58, %v672_v32  ;;  %v750_v29 = vadd.f32 %v749_v9, %v748_v53 }
  0xd1   :  { %v762_v10 = vadd.f32 %v761_v52, %v1903_v19  ;;  %v678_v34 = vmul.f32 -0.013000454, %v675_v0  ;;  %v681_v35 = vmul.f32 64.01729, %v675_v0  ;;  %v757_v51 = vadd.f32 %v756_v37, %v755_v63 }
  0xd2   :  { %v745_v45 = vmul.f32 0.008333334, %v744_v14  ;;  %v677_v46 = vmul.f32 63.853336, %v674_v59  ;;  %v680_v28 = vmul.f32 -0.013000454, %v674_v59  ;;  %v676_v23 = vsub.f32 %v1880_v26, %v673_v8 }
  0xd3   :  { %v764_v44 = vadd.f32 %v763_v6, %v762_v10 }
  0xd4   :  { %v746_v41 = vadd.f32 %v853_v48, %v745_v45  ;;  %v679_v17 = vadd.f32 %v678_v34, %v677_v46  ;;  %v683_v18 = vmul.f32 44.906116, %v676_v23  ;;  %v682_v13 = vadd.f32 %v681_v35, %v680_v28 }
  0xd6   :  { %784 = vst [vmem:[#allocation7 + $0x40] sm:$0xff] %v746_v41  ;;  %v751_v21 = vadd.f32 %v750_v29, %v679_v17  ;;  %v765_v39 = vadd.f32 %v764_v44, %v683_v18  ;;  %v758_v62 = vadd.f32 %v757_v51, %v682_v13 }
  0xd8   :  { %v752_v30 = vmul.f32 0.008333334, %v751_v21  ;;  %v766_v11 = vmul.f32 0.008333334, %v765_v39  ;;  %v759_v22 = vmul.f32 0.008333334, %v758_v62 }
  0xda   :  { %v753_v27 = vadd.f32 %v854_v1, %v752_v30  ;;  %v767_v26 = vadd.f32 %v1665_v49, %v766_v11  ;;  %v760_v5 = vadd.f32 %v855_v57, %v759_v22 }
  0xdc   :  { %786 = vst [vmem:[#allocation7 + $0x48] sm:$0xff] %v753_v27  ;;  %790 = vst [vmem:[#allocation7 + $0x58] sm:$0xff] %v767_v26 }
  0xdd   :  { %788 = vst [vmem:[#allocation7 + $0x50] sm:$0xff] %v760_v5 }
  0xde   :  { %911 = shalt.err (!%p908_p6)
}
  0xdf   :  { %s912_s10 = scalar_lea.hbm %s1801_s2, 1536 }
  0xe0   :  { %p913_p7 = scmp.ne.s32.totalorder %s1801_s2, %s912_s10  ;;  %p916_p8 = scmp.lt.u32.totalorder %s912_s10, %s1801_s2 }
  0xe2   :  { %p918_p9 = pnand %p916_p8, %p913_p7 }
  0xe4   :  { %921 = shalt.err (!%p918_p9)
}
  0xe5   :  { %802 = dma.vmem_to_hbm [thread:$0]  %s797_s6, 1536, %s1801_s2, [#allocation4], %s929_s19, %s929_s19, %s930_s20  }
  0xe6   :  { %926 = dma.done.wait [#allocation4], 1536  }
  0xe7   :  { %927 = vsyncadd [#allocation4], 4294965760 }
  0xe8   :  { %806 = vsyncpa [#allocation3], 1 }
  0xe9   :  { %807 = vsyncpa [#allocation6], 1 }
  0xea   :  { %808 = vsyncpa [#allocation4], 1 }

</bundles_post_ra>
